<compile_context>
chip_gen: v7x
topology: tpu7x:2x2x1
jax: 0.10.0
libtpu: 0.0.40
codegen_flags: <defaults>
</compile_context>

<pallas_src>
import functools

import numpy as np
import jax
import jax.numpy as jnp
from jax.experimental import pallas as pl
from jax.experimental.pallas import tpu as pltpu


_TM_MAX, _TN_MAX = 512, 512      # matmul row/col tile caps (bf16 operands)
_TK_MAX = 1024                   # K tile in the (rare) tiled-K fallback path
_TK_FULL_MAX = 4096              # keep the whole contraction in VMEM up to this K
_LN_TM_MAX = 1024                # standalone LayerNorm row tile


def _round_up(x, m):
    return ((x + m - 1) // m) * m


@functools.lru_cache(maxsize=None)
def _vmem_limit():
    """Generation-aware scoped-VMEM limit (~3/4 of physical), safe fallback."""
    try:
        info = pltpu.get_tpu_info()
        cap = None
        for name in ("vmem_capacity_bytes", "vmem_size_bytes", "vmem_bytes"):
            cap = getattr(info, name, None)
            if cap:
                break
        if cap:
            return int(min(cap * 3 // 4, 100 * 1024 * 1024))
    except Exception:
        pass
    return 32 * 1024 * 1024


def _choose_tile(dim, max_tile, align):
    """Return (tile, padded_dim).

    Dims at or under `max_tile` use one full-extent block (no padding, exempt
    from (8,128) alignment).  Larger dims pick the aligned tile in
    [max_tile//2, max_tile] minimizing padding (largest tile wins ties)."""
    if dim <= max_tile:
        return dim, dim
    best_tile, best_pad = max_tile, _round_up(dim, max_tile)
    lo = max(align, (max_tile // 2 // align) * align)
    cand = max_tile
    while cand >= lo:
        padded = _round_up(dim, cand)
        if padded < best_pad:
            best_tile, best_pad = cand, padded
        cand -= align
    return best_tile, best_pad


# ----------------------------------------------------------------------------
# Pallas kernels
# ----------------------------------------------------------------------------

def _make_fullk_linear_kernel(has_ln, has_bias, has_residual, activation,
                              compute_dtype):
    """Single-pass matmul with optional fused LayerNorm prologue and fused
    bias / QuickGELU / residual epilogue.  Ref order:
    x, [ln_g, ln_b], w, [bias], [residual], out."""

    def kernel(*refs):
        idx = 0
        x_ref = refs[idx]; idx += 1
        if has_ln:
            g_ref = refs[idx]
            bt_ref = refs[idx + 1]
            idx += 2
        w_ref = refs[idx]; idx += 1
        if has_bias:
            b_ref = refs[idx]; idx += 1
        if has_residual:
            r_ref = refs[idx]; idx += 1
        o_ref = refs[idx]

        x = x_ref[...]
        if has_ln:
            xf = x.astype(jnp.float32)
            mean = jnp.mean(xf, axis=-1, keepdims=True)
            var = jnp.mean(jnp.square(xf - mean), axis=-1, keepdims=True)
            xf = (xf - mean) * jax.lax.rsqrt(var + 1e-5)
            xf = xf * g_ref[...] + bt_ref[...]
            x = xf.astype(compute_dtype)

        out = jnp.dot(x, w_ref[...], preferred_element_type=jnp.float32)
        if has_bias:
            out = out + b_ref[...].astype(jnp.float32)
        if activation == "quick_gelu":
            out = out * (1.0 / (1.0 + jnp.exp(-1.702 * out)))
        if has_residual:
            out = out + r_ref[...].astype(jnp.float32)
        o_ref[...] = out.astype(o_ref.dtype)

    return kernel


def _make_tiledk_linear_kernel(has_bias, has_residual, activation):
    """Fallback tiled-K matmul with f32 VMEM accumulator (K > _TK_FULL_MAX)."""

    def kernel(*refs):
        idx = 0
        x_ref = refs[idx]; idx += 1
        w_ref = refs[idx]; idx += 1
        b_ref = None
        r_ref = None
        if has_bias:
            b_ref = refs[idx]; idx += 1
        if has_residual:
            r_ref = refs[idx]; idx += 1
        o_ref = refs[idx]
        acc_ref = refs[idx + 1]

        k = pl.program_id(2)

        @pl.when(k == 0)
        def _init():
            acc_ref[...] = jnp.zeros_like(acc_ref)

        acc_ref[...] += jnp.dot(x_ref[...], w_ref[...],
                                preferred_element_type=jnp.float32)

        @pl.when(k == pl.num_programs(2) - 1)
        def _finalize():
            out = acc_ref[...]
            if has_bias:
                out = out + b_ref[...].astype(jnp.float32)
            if activation == "quick_gelu":
                out = out * (1.0 / (1.0 + jnp.exp(-1.702 * out)))
            if has_residual:
                out = out + r_ref[...].astype(jnp.float32)
            o_ref[...] = out.astype(o_ref.dtype)

    return kernel


def _layernorm_kernel(x_ref, g_ref, b_ref, o_ref):
    x = x_ref[...].astype(jnp.float32)
    mean = jnp.mean(x, axis=-1, keepdims=True)
    var = jnp.mean(jnp.square(x - mean), axis=-1, keepdims=True)
    inv = jax.lax.rsqrt(var + 1e-5)
    o_ref[...] = ((x - mean) * inv * g_ref[...] + b_ref[...]).astype(o_ref.dtype)


def _make_keep_mask(S, causal, valid_len):
    """In-kernel (S, S) boolean keep-mask; None when no masking is needed."""
    if not (causal or valid_len < S):
        return None
    col = jax.lax.broadcasted_iota(jnp.int32, (S, S), 1)
    keep = col < valid_len
    if causal:
        row = jax.lax.broadcasted_iota(jnp.int32, (S, S), 0)
        keep = jnp.logical_and(keep, col <= row)
    return keep


def _attn_one_head(q, k, v, keep):
    """Single-head attention; q/k/v bf16 (S, Dh); q already pre-scaled."""
    s = jax.lax.dot_general(q, k, (((1,), (1,)), ((), ())),
                            preferred_element_type=jnp.float32)
    if keep is not None:
        s = jnp.where(keep, s, -1e30)
    s = s - jnp.max(s, axis=-1, keepdims=True)
    p = jnp.exp(s)
    inv = pl.reciprocal(jnp.sum(p, axis=-1, keepdims=True), approx=True)
    return jnp.dot(p.astype(v.dtype), v, preferred_element_type=jnp.float32) * inv


def _attn_kernel_split(q_ref, k_ref, v_ref, o_ref, *, heads, head_dim,
                       causal, valid_len):
    """One (batch, head-group) per grid step; blocks are (1, S, heads*Dh)."""
    S = o_ref.shape[1]
    keep = _make_keep_mask(S, causal, valid_len)
    for h in range(heads):
        lo, hi = h * head_dim, (h + 1) * head_dim
        o_h = _attn_one_head(q_ref[0, :, lo:hi], k_ref[0, :, lo:hi],
                             v_ref[0, :, lo:hi], keep)
        o_ref[0, :, lo:hi] = o_h.astype(o_ref.dtype)


def _attn_kernel_packed(qkv_ref, o_ref, *, heads, head_dim, causal, valid_len):
    """One batch element per grid step; qkv_ref is the packed (1, S, 3D)."""
    S = o_ref.shape[1]
    D = o_ref.shape[2]
    keep = _make_keep_mask(S, causal, valid_len)
    for h in range(heads):
        lo, hi = h * head_dim, (h + 1) * head_dim
        o_h = _attn_one_head(qkv_ref[0, :, lo:hi],
                             qkv_ref[0, :, D + lo:D + hi],
                             qkv_ref[0, :, 2 * D + lo:2 * D + hi], keep)
        o_ref[0, :, lo:hi] = o_h.astype(o_ref.dtype)


# ----------------------------------------------------------------------------
# pallas_call wrappers
# ----------------------------------------------------------------------------

def pallas_layernorm(x, g, b, out_dtype=jnp.float32):
    M, D = x.shape
    tm, Mp = _choose_tile(M, _LN_TM_MAX, 8)
    xp = jnp.pad(x, ((0, Mp - M), (0, 0))) if Mp != M else x
    g2 = g.reshape(1, D).astype(jnp.float32)
    b2 = b.reshape(1, D).astype(jnp.float32)

    out = pl.pallas_call(
        _layernorm_kernel,
        out_shape=jax.ShapeDtypeStruct((Mp, D), out_dtype),
        grid=(Mp // tm,),
        in_specs=[pl.BlockSpec((tm, D), lambda i: (i, 0)),
                  pl.BlockSpec((1, D), lambda i: (0, 0)),
                  pl.BlockSpec((1, D), lambda i: (0, 0))],
        out_specs=pl.BlockSpec((tm, D), lambda i: (i, 0)),
        compiler_params=pltpu.CompilerParams(
            dimension_semantics=("parallel",),
            vmem_limit_bytes=_vmem_limit()),
    )(xp, g2, b2)
    return out[:M] if Mp != M else out


def pallas_linear(x, w, b=None, residual=None, activation=None,
                  ln_gamma=None, ln_beta=None,
                  out_dtype=jnp.float32, compute_dtype=jnp.bfloat16):
    """out = act(layernorm?(x) @ w + b) + residual, on the MXU."""
    M, K = x.shape
    Kw, N = w.shape
    assert K == Kw

    has_ln = ln_gamma is not None
    full_k = K <= _TK_FULL_MAX
    if has_ln and not full_k:
        # LN needs the whole row; fall back to a standalone LN pass.
        x = pallas_layernorm(x, ln_gamma, ln_beta, out_dtype=compute_dtype)
        has_ln = False

    w = w.astype(compute_dtype)
    if not has_ln:
        x = x.astype(compute_dtype)   # with fused LN the kernel casts post-normalize

    tm, Mp = _choose_tile(M, _TM_MAX, 8)
    tn, Np = _choose_tile(N, _TN_MAX, 128)
    tk, Kp = (K, K) if full_k else _choose_tile(K, _TK_MAX, 128)

    if Mp != M or Kp != K:
        x = jnp.pad(x, ((0, Mp - M), (0, Kp - K)))
    if Kp != K or Np != N:
        w = jnp.pad(w, ((0, Kp - K), (0, Np - N)))

    has_bias = b is not None
    has_res = residual is not None
    if has_bias:
        b2 = b.reshape(1, N).astype(jnp.float32)
        if Np != N:
            b2 = jnp.pad(b2, ((0, 0), (0, Np - N)))
    if has_res:
        r = residual.astype(jnp.float32)
        if Mp != M or Np != N:
            r = jnp.pad(r, ((0, Mp - M), (0, Np - N)))

    if full_k:
        grid = (Mp // tm, Np // tn)
        dims = ("parallel", "parallel")
        kernel = _make_fullk_linear_kernel(has_ln, has_bias, has_res,
                                           activation, compute_dtype)
        in_specs = [pl.BlockSpec((tm, K), lambda i, j: (i, 0))]
        args = [x]
        if has_ln:
            in_specs += [pl.BlockSpec((1, K), lambda i, j: (0, 0)),
                         pl.BlockSpec((1, K), lambda i, j: (0, 0))]
            args += [ln_gamma.reshape(1, K).astype(jnp.float32),
                     ln_beta.reshape(1, K).astype(jnp.float32)]
        in_specs.append(pl.BlockSpec((K, tn), lambda i, j: (0, j)))
        args.append(w)
        if has_bias:
            in_specs.append(pl.BlockSpec((1, tn), lambda i, j: (0, j)))
            args.append(b2)
        if has_res:
            in_specs.append(pl.BlockSpec((tm, tn), lambda i, j: (i, j)))
            args.append(r)
        out_specs = pl.BlockSpec((tm, tn), lambda i, j: (i, j))
        scratch = []
    else:
        grid = (Mp // tm, Np // tn, Kp // tk)
        dims = ("parallel", "parallel", "arbitrary")
        kernel = _make_tiledk_linear_kernel(has_bias, has_res, activation)
        in_specs = [pl.BlockSpec((tm, tk), lambda i, j, k: (i, k)),
                    pl.BlockSpec((tk, tn), lambda i, j, k: (k, j))]
        args = [x, w]
        if has_bias:
            in_specs.append(pl.BlockSpec((1, tn), lambda i, j, k: (0, j)))
            args.append(b2)
        if has_res:
            in_specs.append(pl.BlockSpec((tm, tn), lambda i, j, k: (i, j)))
            args.append(r)
        out_specs = pl.BlockSpec((tm, tn), lambda i, j, k: (i, j))
        scratch = [pltpu.VMEM((tm, tn), jnp.float32)]

    out = pl.pallas_call(
        kernel,
        out_shape=jax.ShapeDtypeStruct((Mp, Np), out_dtype),
        grid=grid,
        in_specs=in_specs,
        out_specs=out_specs,
        scratch_shapes=scratch,
        compiler_params=pltpu.CompilerParams(
            dimension_semantics=dims,
            vmem_limit_bytes=_vmem_limit()),
    )(*args)

    if Mp != M or Np != N:
        out = out[:M, :N]
    return out


def pallas_matmul(x, w, out_dtype=jnp.float32, compute_dtype=jnp.bfloat16):
    return pallas_linear(x, w, out_dtype=out_dtype, compute_dtype=compute_dtype)


def pallas_attention(qkv, num_heads, causal, valid_len, out_dtype=jnp.bfloat16):
    """qkv: (B, S, 3D) packed projection output (q already pre-scaled via the
    weight fold); returns (B, S, D)."""
    B, S, threeD = qkv.shape
    D = threeD // 3
    Dh = D // num_heads
    qkv = qkv.astype(jnp.bfloat16)
    vmem = _vmem_limit()

    # Smallest head-group whose lane width (heads*Dh) is a multiple of 128:
    # enables per-group blocks (more parallel grid steps, lane-dense slabs).
    hg = None
    for cand in range(1, num_heads + 1):
        if num_heads % cand == 0 and (cand * Dh) % 128 == 0:
            hg = cand
            break

    if hg is not None:
        G = hg * Dh
        groups = num_heads // hg
        koff = D // G
        kernel = functools.partial(_attn_kernel_split, heads=hg, head_dim=Dh,
                                   causal=causal, valid_len=valid_len)
        return pl.pallas_call(
            kernel,
            out_shape=jax.ShapeDtypeStruct((B, S, D), out_dtype),
            grid=(B, groups),
            in_specs=[pl.BlockSpec((1, S, G), lambda b, g: (b, 0, g)),
                      pl.BlockSpec((1, S, G), lambda b, g: (b, 0, koff + g)),
                      pl.BlockSpec((1, S, G), lambda b, g: (b, 0, 2 * koff + g))],
            out_specs=pl.BlockSpec((1, S, G), lambda b, g: (b, 0, g)),
            compiler_params=pltpu.CompilerParams(
                dimension_semantics=("parallel", "parallel"),
                vmem_limit_bytes=vmem),
        )(qkv, qkv, qkv)

    # Tiny-dim fallback: one full-extent (1, S, 3D) block per batch element.
    kernel = functools.partial(_attn_kernel_packed, heads=num_heads,
                               head_dim=Dh, causal=causal, valid_len=valid_len)
    return pl.pallas_call(
        kernel,
        out_shape=jax.ShapeDtypeStruct((B, S, D), out_dtype),
        grid=(B,),
        in_specs=[pl.BlockSpec((1, S, threeD), lambda b: (b, 0, 0))],
        out_specs=pl.BlockSpec((1, S, D), lambda b: (b, 0, 0)),
        compiler_params=pltpu.CompilerParams(
            dimension_semantics=("parallel",),
            vmem_limit_bytes=vmem),
    )(qkv)


# ----------------------------------------------------------------------------
# CLIP building blocks (glue in plain JAX, compute in Pallas)
# ----------------------------------------------------------------------------

def residual_attention_block(x, p, num_heads, causal, valid_len):
    B, S, D = x.shape
    xf = x.reshape(B * S, D)                                   # f32 residual stream

    # attention sub-layer: ln1 fused into in_proj, residual fused into out_proj
    qkv = pallas_linear(xf, p["in_proj_w"], p["in_proj_b"],
                        ln_gamma=p["ln1_g"], ln_beta=p["ln1_b"],
                        out_dtype=jnp.bfloat16)
    attn = pallas_attention(qkv.reshape(B, S, 3 * D), num_heads, causal, valid_len)
    xf = pallas_linear(attn.reshape(B * S, D), p["out_proj_w"], p["out_proj_b"],
                       residual=xf, out_dtype=jnp.float32)

    # MLP sub-layer: ln2 + bias + QuickGELU fused into fc, residual into proj
    h = pallas_linear(xf, p["fc_w"], p["fc_b"], activation="quick_gelu",
                      ln_gamma=p["ln2_g"], ln_beta=p["ln2_b"],
                      out_dtype=jnp.bfloat16)
    xf = pallas_linear(h, p["proj_w"], p["proj_b"],
                       residual=xf, out_dtype=jnp.float32)
    return xf.reshape(B, S, D)


def encode_text(tokens, params, cfg):
    B, S = tokens.shape
    x = params["token_embedding"][tokens]                      # glue gather
    x = x + params["pos_embedding"][None, :S, :]

    S_pad = _round_up(S, 8)
    if S_pad != S:
        x = jnp.pad(x, ((0, 0), (0, S_pad - S), (0, 0)))

    for blk in params["text_blocks"]:
        x = residual_attention_block(x, blk, cfg["text_heads"],
                                     causal=True, valid_len=S)

    eot = jnp.argmax(tokens, axis=-1)                          # glue
    feats = x[jnp.arange(B), eot]                              # (B, D); LN is per-row,
    # ln_final fused into the text projection matmul (kept f32).
    return pallas_linear(feats, params["text_projection"],
                         ln_gamma=params["ln_final_g"], ln_beta=params["ln_final_b"],
                         out_dtype=jnp.float32, compute_dtype=jnp.float32)


def encode_image(images, params, cfg):
    B, C, H, W = images.shape
    P = cfg["patch_size"]
    gh, gw = H // P, W // P
    vw = cfg["vision_width"]

    # unfold NCHW image into patch matrix (glue); conv == matmul since stride==P
    patches = (images.reshape(B, C, gh, P, gw, P)
                     .transpose(0, 2, 4, 1, 3, 5)
                     .reshape(B * gh * gw, C * P * P))
    x = pallas_matmul(patches, params["conv_w"]).reshape(B, gh * gw, vw)

    cls = jnp.broadcast_to(params["class_embedding"][None, None, :].astype(x.dtype),
                           (B, 1, vw))
    x = jnp.concatenate([cls, x], axis=1)                      # (B, S, vw)
    x = x + params["vis_pos_embedding"][None, :, :]

    S = x.shape[1]
    S_pad = _round_up(S, 8)
    if S_pad != S:
        x = jnp.pad(x, ((0, 0), (0, S_pad - S), (0, 0)))

    x = pallas_layernorm(x.reshape(B * S_pad, vw),
                         params["ln_pre_g"], params["ln_pre_b"]).reshape(B, S_pad, vw)

    for blk in params["vis_blocks"]:
        x = residual_attention_block(x, blk, cfg["vision_heads"],
                                     causal=False, valid_len=S)

    cls_tok = x[:, 0, :]                                       # (B, vw)
    # ln_post fused into the visual projection matmul (kept f32).
    return pallas_linear(cls_tok, params["visual_projection"],
                         ln_gamma=params["ln_post_g"], ln_beta=params["ln_post_b"],
                         out_dtype=jnp.float32, compute_dtype=jnp.float32)


def clip_forward(images, texts, text_only, params, cfg):
    """Mirrors CLIP.forward: (image_features, text_features, logit_scale.exp())."""
    text_features = encode_text(texts, params, cfg)
    if text_only:
        image_features = text_features
    else:
        image_features = encode_image(images, params, cfg)
    return image_features, text_features, jnp.exp(params["logit_scale"])


# ----------------------------------------------------------------------------
# Deterministic synthetic parameters + one-time parameter prep
# ----------------------------------------------------------------------------

def init_params(key, cfg):
    keys = list(jax.random.split(key, 256))
    it = iter(keys)

    def nrm(shape, scale=0.02):
        return (scale * jax.random.normal(next(it), shape)).astype(jnp.float32)

    def block(width):
        return dict(
            ln1_g=jnp.ones((1, width), jnp.float32),
            ln1_b=jnp.zeros((1, width), jnp.float32),
            in_proj_w=nrm((width, 3 * width)),
            in_proj_b=nrm((1, 3 * width)),
            out_proj_w=nrm((width, width)),
            out_proj_b=nrm((1, width)),
            ln2_g=jnp.ones((1, width), jnp.float32),
            ln2_b=jnp.zeros((1, width), jnp.float32),
            fc_w=nrm((width, 4 * width)),
            fc_b=nrm((1, 4 * width)),
            proj_w=nrm((4 * width, width)),
            proj_b=nrm((1, width)),
        )

    C, P = cfg["channels"], cfg["patch_size"]
    npatch = (cfg["image_size"] // P) ** 2
    vw, tw = cfg["vision_width"], cfg["text_width"]

    return dict(
        # text tower
        token_embedding=nrm((cfg["vocab_size"], tw)),
        pos_embedding=nrm((cfg["context_length"], tw)),
        text_blocks=[block(tw) for _ in range(cfg["text_layers"])],
        ln_final_g=jnp.ones((1, tw), jnp.float32),
        ln_final_b=jnp.zeros((1, tw), jnp.float32),
        text_projection=nrm((tw, cfg["embed_dim"])),
        # vision tower
        conv_w=nrm((C * P * P, vw)),            # conv1.weight reshaped/transposed
        class_embedding=nrm((vw,)),
        vis_pos_embedding=nrm((npatch + 1, vw)),
        ln_pre_g=jnp.ones((1, vw), jnp.float32),
        ln_pre_b=jnp.zeros((1, vw), jnp.float32),
        vis_blocks=[block(vw) for _ in range(cfg["vision_layers"])],
        ln_post_g=jnp.ones((1, vw), jnp.float32),
        ln_post_b=jnp.zeros((1, vw), jnp.float32),
        visual_projection=nrm((vw, cfg["embed_dim"])),
        logit_scale=jnp.array(np.log(1.0 / 0.07), dtype=jnp.float32),
    )


def prepare_params(params, cfg):
    """One-time prep: fold the 1/sqrt(Dh) attention scale into the q slice of
    in_proj (in f32), then pre-cast all MXU weights to bf16 so the forward
    pass incurs no per-call astype/pad HBM traffic."""
    def prep_blocks(blocks, width, heads):
        scale = 1.0 / float(np.sqrt(width // heads))
        out = []
        for blk in blocks:
            blk = dict(blk)
            w = blk["in_proj_w"].astype(jnp.float32)
            bias = blk["in_proj_b"].astype(jnp.float32)
            w = w.at[:, :width].multiply(scale)
            bias = bias.at[:, :width].multiply(scale)
            blk["in_proj_w"] = w.astype(jnp.bfloat16)
            blk["in_proj_b"] = bias
            for name in ("out_proj_w", "fc_w", "proj_w"):
                blk[name] = blk[name].astype(jnp.bfloat16)
            out.append(blk)
        return out

    p = dict(params)
    p["text_blocks"] = prep_blocks(params["text_blocks"],
                                   cfg["text_width"], cfg["text_heads"])
    p["vis_blocks"] = prep_blocks(params["vis_blocks"],
                                  cfg["vision_width"], cfg["vision_heads"])
    p["conv_w"] = params["conv_w"].astype(jnp.bfloat16)
    # final feature projections stay f32 (compute_dtype=f32 at the call site)
    return p


# ----------------------------------------------------------------------------
# main
# ----------------------------------------------------------------------------

if __name__ == "__main__":
    cfg = dict(
        embed_dim=16,
        # vision
        channels=3, image_size=16, patch_size=8,
        vision_width=32, vision_layers=2, vision_heads=4,
        # text
        vocab_size=64, context_length=8,
        text_width=32, text_layers=2, text_heads=4,
    )

    root = jax.random.PRNGKey(0)
    kp, ki, kt = jax.random.split(root, 3)

    params = prepare_params(init_params(kp, cfg), cfg)

    B = 2
    images = jax.random.normal(
        ki, (B, cfg["channels"], cfg["image_size"], cfg["image_size"]),
        dtype=jnp.float32)
    tokens = jax.random.randint(
        kt, (B, cfg["context_length"]), 1, cfg["vocab_size"] - 1, dtype=jnp.int32)
    # put an EOT token (highest id) at the last position so argmax finds it
    tokens = tokens.at[:, -1].set(cfg["vocab_size"] - 1)

    @functools.partial(jax.jit, static_argnums=(2,))
    def fwd(imgs, toks, text_only):
        return clip_forward(imgs, toks, text_only, params, cfg)

    img_feats, txt_feats, scale = fwd(images, tokens, False)
    jax.block_until_ready((img_feats, txt_feats, scale))

    assert img_feats.shape == (B, cfg["embed_dim"])
    assert txt_feats.shape == (B, cfg["embed_dim"])
    assert scale.shape == ()
    assert bool(jnp.all(jnp.isfinite(img_feats)))
    assert bool(jnp.all(jnp.isfinite(txt_feats)))
    print("KERNEL_OK")
</pallas_src>

<mosaic_0001>
module attributes {stable_mosaic.version = 11 : i64} {
  func.func @kernel(%arg0: i32, %arg1: i32, %arg2: memref<8x192xbf16, #tpu.memory_space<vmem>>, %arg3: memref<192x32xbf16, #tpu.memory_space<vmem>>, %arg4: memref<8x32xf32, #tpu.memory_space<vmem>>) attributes {dimension_semantics = [#tpu.dimension_semantics<parallel>, #tpu.dimension_semantics<parallel>], iteration_bounds = array<i64: 1, 1>, scalar_prefetch = 0 : i64, scratch_operands = 0 : i64, tpu.core_type = #tpu.core_type<tc>, window_params = [{transform_indices = @transform_0, window_bounds = array<i64: 8, 192>}, {transform_indices = @transform_1, window_bounds = array<i64: 192, 32>}, {transform_indices = @transform_2, window_bounds = array<i64: 8, 32>}]} {
    %c0 = arith.constant 0 : index
    %c0_0 = arith.constant 0 : index
    %0 = vector.load %arg2[%c0, %c0_0] : memref<8x192xbf16, #tpu.memory_space<vmem>>, vector<8x192xbf16>
    %c0_1 = arith.constant 0 : index
    %c0_2 = arith.constant 0 : index
    %1 = vector.load %arg3[%c0_1, %c0_2] : memref<192x32xbf16, #tpu.memory_space<vmem>>, vector<192x32xbf16>
    %cst = arith.constant dense<0.000000e+00> : vector<8x32xf32>
    %2 = tpu.matmul %0, %1, %cst {dimension_numbers = #tpu.dot_dimension_numbers<[1], [0], [0], [1], [0, 0, 1, 1], [], []>} : vector<8x192xbf16>, vector<192x32xbf16>, vector<8x32xf32> -> vector<8x32xf32>
    %c0_3 = arith.constant 0 : index
    %c0_4 = arith.constant 0 : index
    %3 = vector.load %arg4[%c0_3, %c0_4] : memref<8x32xf32, #tpu.memory_space<vmem>>, vector<8x32xf32>
    tpu.vector_store %arg4[%c0_3, %c0_4], %2 {strides = array<i32>} : memref<8x32xf32, #tpu.memory_space<vmem>>, vector<8x32xf32>,
    return
  }
  func.func @transform_0(%arg0: i32, %arg1: i32) -> (i32, i32) {
    %c0_i32 = arith.constant 0 : i32
    %c0_i32_0 = arith.constant 0 : i32
    return %arg0, %c0_i32 : i32, i32
  }
  func.func @transform_1(%arg0: i32, %arg1: i32) -> (i32, i32) {
    %c0_i32 = arith.constant 0 : i32
    %c0_i32_0 = arith.constant 0 : i32
    return %c0_i32, %arg1 : i32, i32
  }
  func.func @transform_2(%arg0: i32, %arg1: i32) -> (i32, i32) {
    %c0_i32 = arith.constant 0 : i32
    return %arg0, %arg1 : i32, i32
  }
}

module attributes {stable_mosaic.version = 11 : i64} {
  func.func @_layernorm_kernel(%arg0: i32, %arg1: memref<16x32xf32, #tpu.memory_space<vmem>>, %arg2: memref<1x32xf32, #tpu.memory_space<vmem>>, %arg3: memref<1x32xf32, #tpu.memory_space<vmem>>, %arg4: memref<16x32xf32, #tpu.memory_space<vmem>>) attributes {dimension_semantics = [#tpu.dimension_semantics<parallel>], iteration_bounds = array<i64: 1>, scalar_prefetch = 0 : i64, scratch_operands = 0 : i64, tpu.core_type = #tpu.core_type<tc>, window_params = [{transform_indices = @transform_0, window_bounds = array<i64: 16, 32>}, {pipeline_mode = #tpu.pipeline_mode<synchronous>, transform_indices = @transform_1, window_bounds = array<i64: 1, 32>}, {pipeline_mode = #tpu.pipeline_mode<synchronous>, transform_indices = @transform_2, window_bounds = array<i64: 1, 32>}, {transform_indices = @transform_3, window_bounds = array<i64: 16, 32>}]} {
    %c0 = arith.constant 0 : index
    %c0_0 = arith.constant 0 : index
    %0 = vector.load %arg1[%c0, %c0_0] : memref<16x32xf32, #tpu.memory_space<vmem>>, vector<16x32xf32>
    %cst = arith.constant dense<0.000000e+00> : vector<16xf32>
    %1 = vector.multi_reduction <add>, %0, %cst [1] : vector<16x32xf32> to vector<16xf32>
    %2 = vector.shape_cast %1 : vector<16xf32> to vector<16x1xf32>
    %cst_1 = arith.constant 3.200000e+01 : f32
    %3 = vector.broadcast %cst_1 : f32 to vector<16x1xf32>
    %4 = arith.divf %2, %3 : vector<16x1xf32>
    %5 = vector.broadcast %4 : vector<16x1xf32> to vector<16x32xf32>
    %6 = arith.subf %0, %5 : vector<16x32xf32>
    %7 = arith.mulf %6, %6 : vector<16x32xf32>
    %cst_2 = arith.constant dense<0.000000e+00> : vector<16xf32>
    %8 = vector.multi_reduction <add>, %7, %cst_2 [1] : vector<16x32xf32> to vector<16xf32>
    %9 = vector.shape_cast %8 : vector<16xf32> to vector<16x1xf32>
    %cst_3 = arith.constant 3.200000e+01 : f32
    %10 = vector.broadcast %cst_3 : f32 to vector<16x1xf32>
    %11 = arith.divf %9, %10 : vector<16x1xf32>
    %cst_4 = arith.constant 9.99999974E-6 : f32
    %12 = vector.broadcast %cst_4 : f32 to vector<16x1xf32>
    %13 = arith.addf %11, %12 : vector<16x1xf32>
    %14 = math.rsqrt %13 : vector<16x1xf32>
    %15 = vector.broadcast %4 : vector<16x1xf32> to vector<16x32xf32>
    %16 = arith.subf %0, %15 : vector<16x32xf32>
    %17 = vector.broadcast %14 : vector<16x1xf32> to vector<16x32xf32>
    %18 = arith.mulf %16, %17 : vector<16x32xf32>
    %c0_5 = arith.constant 0 : index
    %c0_6 = arith.constant 0 : index
    %19 = vector.load %arg2[%c0_5, %c0_6] : memref<1x32xf32, #tpu.memory_space<vmem>>, vector<1x32xf32>
    %20 = vector.broadcast %19 : vector<1x32xf32> to vector<16x32xf32>
    %21 = arith.mulf %18, %20 : vector<16x32xf32>
    %c0_7 = arith.constant 0 : index
    %c0_8 = arith.constant 0 : index
    %22 = vector.load %arg3[%c0_7, %c0_8] : memref<1x32xf32, #tpu.memory_space<vmem>>, vector<1x32xf32>
    %23 = vector.broadcast %22 : vector<1x32xf32> to vector<16x32xf32>
    %24 = arith.addf %21, %23 : vector<16x32xf32>
    %c0_9 = arith.constant 0 : index
    %c0_10 = arith.constant 0 : index
    %25 = vector.load %arg4[%c0_9, %c0_10] : memref<16x32xf32, #tpu.memory_space<vmem>>, vector<16x32xf32>
    tpu.vector_store %arg4[%c0_9, %c0_10], %24 {strides = array<i32>} : memref<16x32xf32, #tpu.memory_space<vmem>>, vector<16x32xf32>,
    return
  }
  func.func @transform_0(%arg0: i32) -> (i32, i32) {
    %c0_i32 = arith.constant 0 : i32
    %c0_i32_0 = arith.constant 0 : i32
    return %arg0, %c0_i32 : i32, i32
  }
  func.func @transform_1(%arg0: i32) -> (i32, i32) {
    %c0_i32 = arith.constant 0 : i32
    %c0_i32_0 = arith.constant 0 : i32
    %c0_i32_1 = arith.constant 0 : i32
    return %c0_i32, %c0_i32_0 : i32, i32
  }
  func.func @transform_2(%arg0: i32) -> (i32, i32) {
    %c0_i32 = arith.constant 0 : i32
    %c0_i32_0 = arith.constant 0 : i32
    %c0_i32_1 = arith.constant 0 : i32
    return %c0_i32, %c0_i32_0 : i32, i32
  }
  func.func @transform_3(%arg0: i32) -> (i32, i32) {
    %c0_i32 = arith.constant 0 : i32
    %c0_i32_0 = arith.constant 0 : i32
    return %arg0, %c0_i32 : i32, i32
  }
}

module attributes {stable_mosaic.version = 11 : i64} {
  func.func @kernel(%arg0: i32, %arg1: i32, %arg2: memref<16x32xf32, #tpu.memory_space<vmem>>, %arg3: memref<1x32xf32, #tpu.memory_space<vmem>>, %arg4: memref<1x32xf32, #tpu.memory_space<vmem>>, %arg5: memref<32x96xbf16, #tpu.memory_space<vmem>>, %arg6: memref<1x96xf32, #tpu.memory_space<vmem>>, %arg7: memref<16x96xbf16, #tpu.memory_space<vmem>>) attributes {dimension_semantics = [#tpu.dimension_semantics<parallel>, #tpu.dimension_semantics<parallel>], iteration_bounds = array<i64: 1, 1>, scalar_prefetch = 0 : i64, scratch_operands = 0 : i64, tpu.core_type = #tpu.core_type<tc>, window_params = [{transform_indices = @transform_0, window_bounds = array<i64: 16, 32>}, {pipeline_mode = #tpu.pipeline_mode<synchronous>, transform_indices = @transform_1, window_bounds = array<i64: 1, 32>}, {pipeline_mode = #tpu.pipeline_mode<synchronous>, transform_indices = @transform_2, window_bounds = array<i64: 1, 32>}, {transform_indices = @transform_3, window_bounds = array<i64: 32, 96>}, {transform_indices = @transform_4, window_bounds = array<i64: 1, 96>}, {transform_indices = @transform_5, window_bounds = array<i64: 16, 96>}]} {
    %c0 = arith.constant 0 : index
    %c0_0 = arith.constant 0 : index
    %0 = vector.load %arg2[%c0, %c0_0] : memref<16x32xf32, #tpu.memory_space<vmem>>, vector<16x32xf32>
    %cst = arith.constant dense<0.000000e+00> : vector<16xf32>
    %1 = vector.multi_reduction <add>, %0, %cst [1] : vector<16x32xf32> to vector<16xf32>
    %2 = vector.shape_cast %1 : vector<16xf32> to vector<16x1xf32>
    %cst_1 = arith.constant 3.200000e+01 : f32
    %3 = vector.broadcast %cst_1 : f32 to vector<16x1xf32>
    %4 = arith.divf %2, %3 : vector<16x1xf32>
    %5 = vector.broadcast %4 : vector<16x1xf32> to vector<16x32xf32>
    %6 = arith.subf %0, %5 : vector<16x32xf32>
    %7 = arith.mulf %6, %6 : vector<16x32xf32>
    %cst_2 = arith.constant dense<0.000000e+00> : vector<16xf32>
    %8 = vector.multi_reduction <add>, %7, %cst_2 [1] : vector<16x32xf32> to vector<16xf32>
    %9 = vector.shape_cast %8 : vector<16xf32> to vector<16x1xf32>
    %cst_3 = arith.constant 3.200000e+01 : f32
    %10 = vector.broadcast %cst_3 : f32 to vector<16x1xf32>
    %11 = arith.divf %9, %10 : vector<16x1xf32>
    %12 = vector.broadcast %4 : vector<16x1xf32> to vector<16x32xf32>
    %13 = arith.subf %0, %12 : vector<16x32xf32>
    %cst_4 = arith.constant 9.99999974E-6 : f32
    %14 = vector.broadcast %cst_4 : f32 to vector<16x1xf32>
    %15 = arith.addf %11, %14 : vector<16x1xf32>
    %16 = math.rsqrt %15 : vector<16x1xf32>
    %17 = vector.broadcast %16 : vector<16x1xf32> to vector<16x32xf32>
    %18 = arith.mulf %13, %17 : vector<16x32xf32>
    %c0_5 = arith.constant 0 : index
    %c0_6 = arith.constant 0 : index
    %19 = vector.load %arg3[%c0_5, %c0_6] : memref<1x32xf32, #tpu.memory_space<vmem>>, vector<1x32xf32>
    %20 = vector.broadcast %19 : vector<1x32xf32> to vector<16x32xf32>
    %21 = arith.mulf %18, %20 : vector<16x32xf32>
    %c0_7 = arith.constant 0 : index
    %c0_8 = arith.constant 0 : index
    %22 = vector.load %arg4[%c0_7, %c0_8] : memref<1x32xf32, #tpu.memory_space<vmem>>, vector<1x32xf32>
    %23 = vector.broadcast %22 : vector<1x32xf32> to vector<16x32xf32>
    %24 = arith.addf %21, %23 : vector<16x32xf32>
    %25 = arith.truncf %24 : vector<16x32xf32> to vector<16x32xbf16>
    %c0_9 = arith.constant 0 : index
    %c0_10 = arith.constant 0 : index
    %26 = vector.load %arg5[%c0_9, %c0_10] : memref<32x96xbf16, #tpu.memory_space<vmem>>, vector<32x96xbf16>
    %cst_11 = arith.constant dense<0.000000e+00> : vector<16x96xf32>
    %27 = tpu.matmul %25, %26, %cst_11 {dimension_numbers = #tpu.dot_dimension_numbers<[1], [0], [0], [1], [0, 0, 1, 1], [], []>} : vector<16x32xbf16>, vector<32x96xbf16>, vector<16x96xf32> -> vector<16x96xf32>
    %c0_12 = arith.constant 0 : index
    %c0_13 = arith.constant 0 : index
    %28 = vector.load %arg6[%c0_12, %c0_13] : memref<1x96xf32, #tpu.memory_space<vmem>>, vector<1x96xf32>
    %29 = vector.broadcast %28 : vector<1x96xf32> to vector<16x96xf32>
    %30 = arith.addf %27, %29 : vector<16x96xf32>
    %31 = arith.truncf %30 : vector<16x96xf32> to vector<16x96xbf16>
    %c0_14 = arith.constant 0 : index
    %c0_15 = arith.constant 0 : index
    %32 = vector.load %arg7[%c0_14, %c0_15] : memref<16x96xbf16, #tpu.memory_space<vmem>>, vector<16x96xbf16>
    tpu.vector_store %arg7[%c0_14, %c0_15], %31 {strides = array<i32>} : memref<16x96xbf16, #tpu.memory_space<vmem>>, vector<16x96xbf16>,
    return
  }
  func.func @transform_0(%arg0: i32, %arg1: i32) -> (i32, i32) {
    %c0_i32 = arith.constant 0 : i32
    %c0_i32_0 = arith.constant 0 : i32
    return %arg0, %c0_i32 : i32, i32
  }
  func.func @transform_1(%arg0: i32, %arg1: i32) -> (i32, i32) {
    %c0_i32 = arith.constant 0 : i32
    %c0_i32_0 = arith.constant 0 : i32
    %c0_i32_1 = arith.constant 0 : i32
    return %c0_i32, %c0_i32_0 : i32, i32
  }
  func.func @transform_2(%arg0: i32, %arg1: i32) -> (i32, i32) {
    %c0_i32 = arith.constant 0 : i32
    %c0_i32_0 = arith.constant 0 : i32
    %c0_i32_1 = arith.constant 0 : i32
    return %c0_i32, %c0_i32_0 : i32, i32
  }
  func.func @transform_3(%arg0: i32, %arg1: i32) -> (i32, i32) {
    %c0_i32 = arith.constant 0 : i32
    %c0_i32_0 = arith.constant 0 : i32
    return %c0_i32, %arg1 : i32, i32
  }
  func.func @transform_4(%arg0: i32, %arg1: i32) -> (i32, i32) {
    %c0_i32 = arith.constant 0 : i32
    %c0_i32_0 = arith.constant 0 : i32
    return %c0_i32, %arg1 : i32, i32
  }
  func.func @transform_5(%arg0: i32, %arg1: i32) -> (i32, i32) {
    %c0_i32 = arith.constant 0 : i32
    return %arg0, %arg1 : i32, i32
  }
}

module attributes {stable_mosaic.version = 11 : i64} {
  func.func @_attn_kernel_packed(%arg0: i32, %arg1: memref<1x8x96xbf16, #tpu.memory_space<vmem>>, %arg2: memref<1x8x32xbf16, #tpu.memory_space<vmem>>) attributes {dimension_semantics = [#tpu.dimension_semantics<parallel>], iteration_bounds = array<i64: 2>, scalar_prefetch = 0 : i64, scratch_operands = 0 : i64, tpu.core_type = #tpu.core_type<tc>, window_params = [{transform_indices = @transform_0, window_bounds = array<i64: 1, 8, 96>}, {transform_indices = @transform_1, window_bounds = array<i64: 1, 8, 32>}]} {
    %0 = tpu.iota {dimensions = array<i32: 1>} : vector<8x8xi32>
    %c5_i32 = arith.constant 5 : i32
    %1 = vector.broadcast %c5_i32 : i32 to vector<8x8xi32>
    %2 = arith.cmpi slt, %0, %1 : vector<8x8xi32>
    %c0 = arith.constant 0 : index
    %c0_0 = arith.constant 0 : index
    %c0_1 = arith.constant 0 : index
    %3 = vector.load %arg1[%c0, %c0_0, %c0_1] : memref<1x8x96xbf16, #tpu.memory_space<vmem>>, vector<1x8x8xbf16>
    %4 = vector.shape_cast %3 : vector<1x8x8xbf16> to vector<8x8xbf16>
    %c0_2 = arith.constant 0 : index
    %c0_3 = arith.constant 0 : index
    %c32 = arith.constant 32 : index
    %5 = vector.load %arg1[%c0_2, %c0_3, %c32] : memref<1x8x96xbf16, #tpu.memory_space<vmem>>, vector<1x8x8xbf16>
    %6 = vector.shape_cast %5 : vector<1x8x8xbf16> to vector<8x8xbf16>
    %c0_4 = arith.constant 0 : index
    %c0_5 = arith.constant 0 : index
    %c64 = arith.constant 64 : index
    %7 = vector.load %arg1[%c0_4, %c0_5, %c64] : memref<1x8x96xbf16, #tpu.memory_space<vmem>>, vector<1x8x8xbf16>
    %8 = vector.shape_cast %7 : vector<1x8x8xbf16> to vector<8x8xbf16>
    %cst = arith.constant dense<0.000000e+00> : vector<8x8xf32>
    %9 = tpu.matmul %4, %6, %cst {dimension_numbers = #tpu.dot_dimension_numbers<[1], [1], [0], [0], [0, 0, 1, 0], [], []>} : vector<8x8xbf16>, vector<8x8xbf16>, vector<8x8xf32> -> vector<8x8xf32>
    %cst_6 = arith.constant -1.000000e+30 : f32
    %10 = vector.broadcast %cst_6 : f32 to vector<8x8xf32>
    %11 = arith.select %2, %9, %10 : vector<8x8xi1>, vector<8x8xf32>
    %cst_7 = arith.constant dense<0xFF800000> : vector<8xf32>
    %12 = vector.multi_reduction <maximumf>, %11, %cst_7 [1] : vector<8x8xf32> to vector<8xf32>
    %13 = vector.shape_cast %12 : vector<8xf32> to vector<8x1xf32>
    %14 = vector.broadcast %13 : vector<8x1xf32> to vector<8x8xf32>
    %15 = arith.subf %11, %14 : vector<8x8xf32>
    %16 = math.exp %15 : vector<8x8xf32>
    %cst_8 = arith.constant dense<0.000000e+00> : vector<8xf32>
    %17 = vector.multi_reduction <add>, %16, %cst_8 [1] : vector<8x8xf32> to vector<8xf32>
    %18 = vector.shape_cast %17 : vector<8xf32> to vector<8x1xf32>
    %19 = tpu.reciprocal %18 {approx = true} : vector<8x1xf32> -> vector<8x1xf32>
    %20 = arith.truncf %16 : vector<8x8xf32> to vector<8x8xbf16>
    %cst_9 = arith.constant dense<0.000000e+00> : vector<8x8xf32>
    %21 = tpu.matmul %20, %8, %cst_9 {dimension_numbers = #tpu.dot_dimension_numbers<[1], [0], [0], [1], [0, 0, 1, 1], [], []>} : vector<8x8xbf16>, vector<8x8xbf16>, vector<8x8xf32> -> vector<8x8xf32>
    %22 = vector.broadcast %19 : vector<8x1xf32> to vector<8x8xf32>
    %23 = arith.mulf %21, %22 : vector<8x8xf32>
    %24 = arith.truncf %23 : vector<8x8xf32> to vector<8x8xbf16>
    %c0_10 = arith.constant 0 : index
    %c0_11 = arith.constant 0 : index
    %c0_12 = arith.constant 0 : index
    %25 = vector.load %arg2[%c0_10, %c0_11, %c0_12] : memref<1x8x32xbf16, #tpu.memory_space<vmem>>, vector<1x8x8xbf16>
    %26 = vector.shape_cast %25 : vector<1x8x8xbf16> to vector<8x8xbf16>
    %27 = vector.shape_cast %24 : vector<8x8xbf16> to vector<1x8x8xbf16>
    tpu.vector_store %arg2[%c0_10, %c0_11, %c0_12], %27 {strides = array<i32>} : memref<1x8x32xbf16, #tpu.memory_space<vmem>>, vector<1x8x8xbf16>,
    %c0_13 = arith.constant 0 : index
    %c0_14 = arith.constant 0 : index
    %c8 = arith.constant 8 : index
    %28 = vector.load %arg1[%c0_13, %c0_14, %c8] : memref<1x8x96xbf16, #tpu.memory_space<vmem>>, vector<1x8x8xbf16>
    %29 = vector.shape_cast %28 : vector<1x8x8xbf16> to vector<8x8xbf16>
    %c0_15 = arith.constant 0 : index
    %c0_16 = arith.constant 0 : index
    %c40 = arith.constant 40 : index
    %30 = vector.load %arg1[%c0_15, %c0_16, %c40] : memref<1x8x96xbf16, #tpu.memory_space<vmem>>, vector<1x8x8xbf16>
    %31 = vector.shape_cast %30 : vector<1x8x8xbf16> to vector<8x8xbf16>
    %c0_17 = arith.constant 0 : index
    %c0_18 = arith.constant 0 : index
    %c72 = arith.constant 72 : index
    %32 = vector.load %arg1[%c0_17, %c0_18, %c72] : memref<1x8x96xbf16, #tpu.memory_space<vmem>>, vector<1x8x8xbf16>
    %33 = vector.shape_cast %32 : vector<1x8x8xbf16> to vector<8x8xbf16>
    %cst_19 = arith.constant dense<0.000000e+00> : vector<8x8xf32>
    %34 = tpu.matmul %29, %31, %cst_19 {dimension_numbers = #tpu.dot_dimension_numbers<[1], [1], [0], [0], [0, 0, 1, 0], [], []>} : vector<8x8xbf16>, vector<8x8xbf16>, vector<8x8xf32> -> vector<8x8xf32>
    %cst_20 = arith.constant -1.000000e+30 : f32
    %35 = vector.broadcast %cst_20 : f32 to vector<8x8xf32>
    %36 = arith.select %2, %34, %35 : vector<8x8xi1>, vector<8x8xf32>
    %cst_21 = arith.constant dense<0xFF800000> : vector<8xf32>
    %37 = vector.multi_reduction <maximumf>, %36, %cst_21 [1] : vector<8x8xf32> to vector<8xf32>
    %38 = vector.shape_cast %37 : vector<8xf32> to vector<8x1xf32>
    %39 = vector.broadcast %38 : vector<8x1xf32> to vector<8x8xf32>
    %40 = arith.subf %36, %39 : vector<8x8xf32>
    %41 = math.exp %40 : vector<8x8xf32>
    %cst_22 = arith.constant dense<0.000000e+00> : vector<8xf32>
    %42 = vector.multi_reduction <add>, %41, %cst_22 [1] : vector<8x8xf32> to vector<8xf32>
    %43 = vector.shape_cast %42 : vector<8xf32> to vector<8x1xf32>
    %44 = tpu.reciprocal %43 {approx = true} : vector<8x1xf32> -> vector<8x1xf32>
    %45 = arith.truncf %41 : vector<8x8xf32> to vector<8x8xbf16>
    %cst_23 = arith.constant dense<0.000000e+00> : vector<8x8xf32>
    %46 = tpu.matmul %45, %33, %cst_23 {dimension_numbers = #tpu.dot_dimension_numbers<[1], [0], [0], [1], [0, 0, 1, 1], [], []>} : vector<8x8xbf16>, vector<8x8xbf16>, vector<8x8xf32> -> vector<8x8xf32>
    %47 = vector.broadcast %44 : vector<8x1xf32> to vector<8x8xf32>
    %48 = arith.mulf %46, %47 : vector<8x8xf32>
    %49 = arith.truncf %48 : vector<8x8xf32> to vector<8x8xbf16>
    %c0_24 = arith.constant 0 : index
    %c0_25 = arith.constant 0 : index
    %c8_26 = arith.constant 8 : index
    %50 = vector.load %arg2[%c0_24, %c0_25, %c8_26] : memref<1x8x32xbf16, #tpu.memory_space<vmem>>, vector<1x8x8xbf16>
    %51 = vector.shape_cast %50 : vector<1x8x8xbf16> to vector<8x8xbf16>
    %52 = vector.shape_cast %49 : vector<8x8xbf16> to vector<1x8x8xbf16>
    tpu.vector_store %arg2[%c0_24, %c0_25, %c8_26], %52 {strides = array<i32>} : memref<1x8x32xbf16, #tpu.memory_space<vmem>>, vector<1x8x8xbf16>,
    %c0_27 = arith.constant 0 : index
    %c0_28 = arith.constant 0 : index
    %c16 = arith.constant 16 : index
    %53 = vector.load %arg1[%c0_27, %c0_28, %c16] : memref<1x8x96xbf16, #tpu.memory_space<vmem>>, vector<1x8x8xbf16>
    %54 = vector.shape_cast %53 : vector<1x8x8xbf16> to vector<8x8xbf16>
    %c0_29 = arith.constant 0 : index
    %c0_30 = arith.constant 0 : index
    %c48 = arith.constant 48 : index
    %55 = vector.load %arg1[%c0_29, %c0_30, %c48] : memref<1x8x96xbf16, #tpu.memory_space<vmem>>, vector<1x8x8xbf16>
    %56 = vector.shape_cast %55 : vector<1x8x8xbf16> to vector<8x8xbf16>
    %c0_31 = arith.constant 0 : index
    %c0_32 = arith.constant 0 : index
    %c80 = arith.constant 80 : index
    %57 = vector.load %arg1[%c0_31, %c0_32, %c80] : memref<1x8x96xbf16, #tpu.memory_space<vmem>>, vector<1x8x8xbf16>
    %58 = vector.shape_cast %57 : vector<1x8x8xbf16> to vector<8x8xbf16>
    %cst_33 = arith.constant dense<0.000000e+00> : vector<8x8xf32>
    %59 = tpu.matmul %54, %56, %cst_33 {dimension_numbers = #tpu.dot_dimension_numbers<[1], [1], [0], [0], [0, 0, 1, 0], [], []>} : vector<8x8xbf16>, vector<8x8xbf16>, vector<8x8xf32> -> vector<8x8xf32>
    %cst_34 = arith.constant -1.000000e+30 : f32
    %60 = vector.broadcast %cst_34 : f32 to vector<8x8xf32>
    %61 = arith.select %2, %59, %60 : vector<8x8xi1>, vector<8x8xf32>
    %cst_35 = arith.constant dense<0xFF800000> : vector<8xf32>
    %62 = vector.multi_reduction <maximumf>, %61, %cst_35 [1] : vector<8x8xf32> to vector<8xf32>
    %63 = vector.shape_cast %62 : vector<8xf32> to vector<8x1xf32>
    %64 = vector.broadcast %63 : vector<8x1xf32> to vector<8x8xf32>
    %65 = arith.subf %61, %64 : vector<8x8xf32>
    %66 = math.exp %65 : vector<8x8xf32>
    %cst_36 = arith.constant dense<0.000000e+00> : vector<8xf32>
    %67 = vector.multi_reduction <add>, %66, %cst_36 [1] : vector<8x8xf32> to vector<8xf32>
    %68 = vector.shape_cast %67 : vector<8xf32> to vector<8x1xf32>
    %69 = tpu.reciprocal %68 {approx = true} : vector<8x1xf32> -> vector<8x1xf32>
    %70 = arith.truncf %66 : vector<8x8xf32> to vector<8x8xbf16>
    %cst_37 = arith.constant dense<0.000000e+00> : vector<8x8xf32>
    %71 = tpu.matmul %70, %58, %cst_37 {dimension_numbers = #tpu.dot_dimension_numbers<[1], [0], [0], [1], [0, 0, 1, 1], [], []>} : vector<8x8xbf16>, vector<8x8xbf16>, vector<8x8xf32> -> vector<8x8xf32>
    %72 = vector.broadcast %69 : vector<8x1xf32> to vector<8x8xf32>
    %73 = arith.mulf %71, %72 : vector<8x8xf32>
    %74 = arith.truncf %73 : vector<8x8xf32> to vector<8x8xbf16>
    %c0_38 = arith.constant 0 : index
    %c0_39 = arith.constant 0 : index
    %c16_40 = arith.constant 16 : index
    %75 = vector.load %arg2[%c0_38, %c0_39, %c16_40] : memref<1x8x32xbf16, #tpu.memory_space<vmem>>, vector<1x8x8xbf16>
    %76 = vector.shape_cast %75 : vector<1x8x8xbf16> to vector<8x8xbf16>
    %77 = vector.shape_cast %74 : vector<8x8xbf16> to vector<1x8x8xbf16>
    tpu.vector_store %arg2[%c0_38, %c0_39, %c16_40], %77 {strides = array<i32>} : memref<1x8x32xbf16, #tpu.memory_space<vmem>>, vector<1x8x8xbf16>,
    %c0_41 = arith.constant 0 : index
    %c0_42 = arith.constant 0 : index
    %c24 = arith.constant 24 : index
    %78 = vector.load %arg1[%c0_41, %c0_42, %c24] : memref<1x8x96xbf16, #tpu.memory_space<vmem>>, vector<1x8x8xbf16>
    %79 = vector.shape_cast %78 : vector<1x8x8xbf16> to vector<8x8xbf16>
    %c0_43 = arith.constant 0 : index
    %c0_44 = arith.constant 0 : index
    %c56 = arith.constant 56 : index
    %80 = vector.load %arg1[%c0_43, %c0_44, %c56] : memref<1x8x96xbf16, #tpu.memory_space<vmem>>, vector<1x8x8xbf16>
    %81 = vector.shape_cast %80 : vector<1x8x8xbf16> to vector<8x8xbf16>
    %c0_45 = arith.constant 0 : index
    %c0_46 = arith.constant 0 : index
    %c88 = arith.constant 88 : index
    %82 = vector.load %arg1[%c0_45, %c0_46, %c88] : memref<1x8x96xbf16, #tpu.memory_space<vmem>>, vector<1x8x8xbf16>
    %83 = vector.shape_cast %82 : vector<1x8x8xbf16> to vector<8x8xbf16>
    %cst_47 = arith.constant dense<0.000000e+00> : vector<8x8xf32>
    %84 = tpu.matmul %79, %81, %cst_47 {dimension_numbers = #tpu.dot_dimension_numbers<[1], [1], [0], [0], [0, 0, 1, 0], [], []>} : vector<8x8xbf16>, vector<8x8xbf16>, vector<8x8xf32> -> vector<8x8xf32>
    %cst_48 = arith.constant -1.000000e+30 : f32
    %85 = vector.broadcast %cst_48 : f32 to vector<8x8xf32>
    %86 = arith.select %2, %84, %85 : vector<8x8xi1>, vector<8x8xf32>
    %cst_49 = arith.constant dense<0xFF800000> : vector<8xf32>
    %87 = vector.multi_reduction <maximumf>, %86, %cst_49 [1] : vector<8x8xf32> to vector<8xf32>
    %88 = vector.shape_cast %87 : vector<8xf32> to vector<8x1xf32>
    %89 = vector.broadcast %88 : vector<8x1xf32> to vector<8x8xf32>
    %90 = arith.subf %86, %89 : vector<8x8xf32>
    %91 = math.exp %90 : vector<8x8xf32>
    %cst_50 = arith.constant dense<0.000000e+00> : vector<8xf32>
    %92 = vector.multi_reduction <add>, %91, %cst_50 [1] : vector<8x8xf32> to vector<8xf32>
    %93 = vector.shape_cast %92 : vector<8xf32> to vector<8x1xf32>
    %94 = tpu.reciprocal %93 {approx = true} : vector<8x1xf32> -> vector<8x1xf32>
    %95 = arith.truncf %91 : vector<8x8xf32> to vector<8x8xbf16>
    %cst_51 = arith.constant dense<0.000000e+00> : vector<8x8xf32>
    %96 = tpu.matmul %95, %83, %cst_51 {dimension_numbers = #tpu.dot_dimension_numbers<[1], [0], [0], [1], [0, 0, 1, 1], [], []>} : vector<8x8xbf16>, vector<8x8xbf16>, vector<8x8xf32> -> vector<8x8xf32>
    %97 = vector.broadcast %94 : vector<8x1xf32> to vector<8x8xf32>
    %98 = arith.mulf %96, %97 : vector<8x8xf32>
    %99 = arith.truncf %98 : vector<8x8xf32> to vector<8x8xbf16>
    %c0_52 = arith.constant 0 : index
    %c0_53 = arith.constant 0 : index
    %c24_54 = arith.constant 24 : index
    %100 = vector.load %arg2[%c0_52, %c0_53, %c24_54] : memref<1x8x32xbf16, #tpu.memory_space<vmem>>, vector<1x8x8xbf16>
    %101 = vector.shape_cast %100 : vector<1x8x8xbf16> to vector<8x8xbf16>
    %102 = vector.shape_cast %99 : vector<8x8xbf16> to vector<1x8x8xbf16>
    tpu.vector_store %arg2[%c0_52, %c0_53, %c24_54], %102 {strides = array<i32>} : memref<1x8x32xbf16, #tpu.memory_space<vmem>>, vector<1x8x8xbf16>,
    return
  }
  func.func @transform_0(%arg0: i32) -> (i32, i32, i32) {
    %c0_i32 = arith.constant 0 : i32
    %c0_i32_0 = arith.constant 0 : i32
    %c0_i32_1 = arith.constant 0 : i32
    return %arg0, %c0_i32, %c0_i32_0 : i32, i32, i32
  }
  func.func @transform_1(%arg0: i32) -> (i32, i32, i32) {
    %c0_i32 = arith.constant 0 : i32
    %c0_i32_0 = arith.constant 0 : i32
    %c0_i32_1 = arith.constant 0 : i32
    return %arg0, %c0_i32, %c0_i32_0 : i32, i32, i32
  }
}

module attributes {stable_mosaic.version = 11 : i64} {
  func.func @kernel(%arg0: i32, %arg1: i32, %arg2: memref<16x32xbf16, #tpu.memory_space<vmem>>, %arg3: memref<32x32xbf16, #tpu.memory_space<vmem>>, %arg4: memref<1x32xf32, #tpu.memory_space<vmem>>, %arg5: memref<16x32xf32, #tpu.memory_space<vmem>>, %arg6: memref<16x32xf32, #tpu.memory_space<vmem>>) attributes {dimension_semantics = [#tpu.dimension_semantics<parallel>, #tpu.dimension_semantics<parallel>], iteration_bounds = array<i64: 1, 1>, scalar_prefetch = 0 : i64, scratch_operands = 0 : i64, tpu.core_type = #tpu.core_type<tc>, window_params = [{transform_indices = @transform_0, window_bounds = array<i64: 16, 32>}, {transform_indices = @transform_1, window_bounds = array<i64: 32, 32>}, {transform_indices = @transform_2, window_bounds = array<i64: 1, 32>}, {transform_indices = @transform_3, window_bounds = array<i64: 16, 32>}, {transform_indices = @transform_4, window_bounds = array<i64: 16, 32>}]} {
    %c0 = arith.constant 0 : index
    %c0_0 = arith.constant 0 : index
    %0 = vector.load %arg2[%c0, %c0_0] : memref<16x32xbf16, #tpu.memory_space<vmem>>, vector<16x32xbf16>
    %c0_1 = arith.constant 0 : index
    %c0_2 = arith.constant 0 : index
    %1 = vector.load %arg3[%c0_1, %c0_2] : memref<32x32xbf16, #tpu.memory_space<vmem>>, vector<32x32xbf16>
    %cst = arith.constant dense<0.000000e+00> : vector<16x32xf32>
    %2 = tpu.matmul %0, %1, %cst {dimension_numbers = #tpu.dot_dimension_numbers<[1], [0], [0], [1], [0, 0, 1, 1], [], []>} : vector<16x32xbf16>, vector<32x32xbf16>, vector<16x32xf32> -> vector<16x32xf32>
    %c0_3 = arith.constant 0 : index
    %c0_4 = arith.constant 0 : index
    %3 = vector.load %arg4[%c0_3, %c0_4] : memref<1x32xf32, #tpu.memory_space<vmem>>, vector<1x32xf32>
    %4 = vector.broadcast %3 : vector<1x32xf32> to vector<16x32xf32>
    %5 = arith.addf %2, %4 : vector<16x32xf32>
    %c0_5 = arith.constant 0 : index
    %c0_6 = arith.constant 0 : index
    %6 = vector.load %arg5[%c0_5, %c0_6] : memref<16x32xf32, #tpu.memory_space<vmem>>, vector<16x32xf32>
    %7 = arith.addf %5, %6 : vector<16x32xf32>
    %c0_7 = arith.constant 0 : index
    %c0_8 = arith.constant 0 : index
    %8 = vector.load %arg6[%c0_7, %c0_8] : memref<16x32xf32, #tpu.memory_space<vmem>>, vector<16x32xf32>
    tpu.vector_store %arg6[%c0_7, %c0_8], %7 {strides = array<i32>} : memref<16x32xf32, #tpu.memory_space<vmem>>, vector<16x32xf32>,
    return
  }
  func.func @transform_0(%arg0: i32, %arg1: i32) -> (i32, i32) {
    %c0_i32 = arith.constant 0 : i32
    %c0_i32_0 = arith.constant 0 : i32
    return %arg0, %c0_i32 : i32, i32
  }
  func.func @transform_1(%arg0: i32, %arg1: i32) -> (i32, i32) {
    %c0_i32 = arith.constant 0 : i32
    %c0_i32_0 = arith.constant 0 : i32
    return %c0_i32, %arg1 : i32, i32
  }
  func.func @transform_2(%arg0: i32, %arg1: i32) -> (i32, i32) {
    %c0_i32 = arith.constant 0 : i32
    %c0_i32_0 = arith.constant 0 : i32
    return %c0_i32, %arg1 : i32, i32
  }
  func.func @transform_3(%arg0: i32, %arg1: i32) -> (i32, i32) {
    %c0_i32 = arith.constant 0 : i32
    return %arg0, %arg1 : i32, i32
  }
  func.func @transform_4(%arg0: i32, %arg1: i32) -> (i32, i32) {
    %c0_i32 = arith.constant 0 : i32
    return %arg0, %arg1 : i32, i32
  }
}

module attributes {stable_mosaic.version = 11 : i64} {
  func.func @kernel(%arg0: i32, %arg1: i32, %arg2: memref<16x128xbf16, #tpu.memory_space<vmem>>, %arg3: memref<128x32xbf16, #tpu.memory_space<vmem>>, %arg4: memref<1x32xf32, #tpu.memory_space<vmem>>, %arg5: memref<16x32xf32, #tpu.memory_space<vmem>>, %arg6: memref<16x32xf32, #tpu.memory_space<vmem>>) attributes {dimension_semantics = [#tpu.dimension_semantics<parallel>, #tpu.dimension_semantics<parallel>], iteration_bounds = array<i64: 1, 1>, scalar_prefetch = 0 : i64, scratch_operands = 0 : i64, tpu.core_type = #tpu.core_type<tc>, window_params = [{transform_indices = @transform_0, window_bounds = array<i64: 16, 128>}, {transform_indices = @transform_1, window_bounds = array<i64: 128, 32>}, {transform_indices = @transform_2, window_bounds = array<i64: 1, 32>}, {transform_indices = @transform_3, window_bounds = array<i64: 16, 32>}, {transform_indices = @transform_4, window_bounds = array<i64: 16, 32>}]} {
    %c0 = arith.constant 0 : index
    %c0_0 = arith.constant 0 : index
    %0 = vector.load %arg2[%c0, %c0_0] : memref<16x128xbf16, #tpu.memory_space<vmem>>, vector<16x128xbf16>
    %c0_1 = arith.constant 0 : index
    %c0_2 = arith.constant 0 : index
    %1 = vector.load %arg3[%c0_1, %c0_2] : memref<128x32xbf16, #tpu.memory_space<vmem>>, vector<128x32xbf16>
    %cst = arith.constant dense<0.000000e+00> : vector<16x32xf32>
    %2 = tpu.matmul %0, %1, %cst {dimension_numbers = #tpu.dot_dimension_numbers<[1], [0], [0], [1], [0, 0, 1, 1], [], []>} : vector<16x128xbf16>, vector<128x32xbf16>, vector<16x32xf32> -> vector<16x32xf32>
    %c0_3 = arith.constant 0 : index
    %c0_4 = arith.constant 0 : index
    %3 = vector.load %arg4[%c0_3, %c0_4] : memref<1x32xf32, #tpu.memory_space<vmem>>, vector<1x32xf32>
    %4 = vector.broadcast %3 : vector<1x32xf32> to vector<16x32xf32>
    %5 = arith.addf %2, %4 : vector<16x32xf32>
    %c0_5 = arith.constant 0 : index
    %c0_6 = arith.constant 0 : index
    %6 = vector.load %arg5[%c0_5, %c0_6] : memref<16x32xf32, #tpu.memory_space<vmem>>, vector<16x32xf32>
    %7 = arith.addf %5, %6 : vector<16x32xf32>
    %c0_7 = arith.constant 0 : index
    %c0_8 = arith.constant 0 : index
    %8 = vector.load %arg6[%c0_7, %c0_8] : memref<16x32xf32, #tpu.memory_space<vmem>>, vector<16x32xf32>
    tpu.vector_store %arg6[%c0_7, %c0_8], %7 {strides = array<i32>} : memref<16x32xf32, #tpu.memory_space<vmem>>, vector<16x32xf32>,
    return
  }
  func.func @transform_0(%arg0: i32, %arg1: i32) -> (i32, i32) {
    %c0_i32 = arith.constant 0 : i32
    %c0_i32_0 = arith.constant 0 : i32
    return %arg0, %c0_i32 : i32, i32
  }
  func.func @transform_1(%arg0: i32, %arg1: i32) -> (i32, i32) {
    %c0_i32 = arith.constant 0 : i32
    %c0_i32_0 = arith.constant 0 : i32
    return %c0_i32, %arg1 : i32, i32
  }
  func.func @transform_2(%arg0: i32, %arg1: i32) -> (i32, i32) {
    %c0_i32 = arith.constant 0 : i32
    %c0_i32_0 = arith.constant 0 : i32
    return %c0_i32, %arg1 : i32, i32
  }
  func.func @transform_3(%arg0: i32, %arg1: i32) -> (i32, i32) {
    %c0_i32 = arith.constant 0 : i32
    return %arg0, %arg1 : i32, i32
  }
  func.func @transform_4(%arg0: i32, %arg1: i32) -> (i32, i32) {
    %c0_i32 = arith.constant 0 : i32
    return %arg0, %arg1 : i32, i32
  }
}

module attributes {stable_mosaic.version = 11 : i64} {
  func.func @kernel(%arg0: i32, %arg1: i32, %arg2: memref<16x32xf32, #tpu.memory_space<vmem>>, %arg3: memref<1x32xf32, #tpu.memory_space<vmem>>, %arg4: memref<1x32xf32, #tpu.memory_space<vmem>>, %arg5: memref<32x128xbf16, #tpu.memory_space<vmem>>, %arg6: memref<1x128xf32, #tpu.memory_space<vmem>>, %arg7: memref<16x128xbf16, #tpu.memory_space<vmem>>) attributes {dimension_semantics = [#tpu.dimension_semantics<parallel>, #tpu.dimension_semantics<parallel>], iteration_bounds = array<i64: 1, 1>, scalar_prefetch = 0 : i64, scratch_operands = 0 : i64, tpu.core_type = #tpu.core_type<tc>, window_params = [{transform_indices = @transform_0, window_bounds = array<i64: 16, 32>}, {pipeline_mode = #tpu.pipeline_mode<synchronous>, transform_indices = @transform_1, window_bounds = array<i64: 1, 32>}, {pipeline_mode = #tpu.pipeline_mode<synchronous>, transform_indices = @transform_2, window_bounds = array<i64: 1, 32>}, {transform_indices = @transform_3, window_bounds = array<i64: 32, 128>}, {transform_indices = @transform_4, window_bounds = array<i64: 1, 128>}, {transform_indices = @transform_5, window_bounds = array<i64: 16, 128>}]} {
    %c0 = arith.constant 0 : index
    %c0_0 = arith.constant 0 : index
    %0 = vector.load %arg2[%c0, %c0_0] : memref<16x32xf32, #tpu.memory_space<vmem>>, vector<16x32xf32>
    %cst = arith.constant dense<0.000000e+00> : vector<16xf32>
    %1 = vector.multi_reduction <add>, %0, %cst [1] : vector<16x32xf32> to vector<16xf32>
    %2 = vector.shape_cast %1 : vector<16xf32> to vector<16x1xf32>
    %cst_1 = arith.constant 3.200000e+01 : f32
    %3 = vector.broadcast %cst_1 : f32 to vector<16x1xf32>
    %4 = arith.divf %2, %3 : vector<16x1xf32>
    %5 = vector.broadcast %4 : vector<16x1xf32> to vector<16x32xf32>
    %6 = arith.subf %0, %5 : vector<16x32xf32>
    %7 = arith.mulf %6, %6 : vector<16x32xf32>
    %cst_2 = arith.constant dense<0.000000e+00> : vector<16xf32>
    %8 = vector.multi_reduction <add>, %7, %cst_2 [1] : vector<16x32xf32> to vector<16xf32>
    %9 = vector.shape_cast %8 : vector<16xf32> to vector<16x1xf32>
    %cst_3 = arith.constant 3.200000e+01 : f32
    %10 = vector.broadcast %cst_3 : f32 to vector<16x1xf32>
    %11 = arith.divf %9, %10 : vector<16x1xf32>
    %12 = vector.broadcast %4 : vector<16x1xf32> to vector<16x32xf32>
    %13 = arith.subf %0, %12 : vector<16x32xf32>
    %cst_4 = arith.constant 9.99999974E-6 : f32
    %14 = vector.broadcast %cst_4 : f32 to vector<16x1xf32>
    %15 = arith.addf %11, %14 : vector<16x1xf32>
    %16 = math.rsqrt %15 : vector<16x1xf32>
    %17 = vector.broadcast %16 : vector<16x1xf32> to vector<16x32xf32>
    %18 = arith.mulf %13, %17 : vector<16x32xf32>
    %c0_5 = arith.constant 0 : index
    %c0_6 = arith.constant 0 : index
    %19 = vector.load %arg3[%c0_5, %c0_6] : memref<1x32xf32, #tpu.memory_space<vmem>>, vector<1x32xf32>
    %20 = vector.broadcast %19 : vector<1x32xf32> to vector<16x32xf32>
    %21 = arith.mulf %18, %20 : vector<16x32xf32>
    %c0_7 = arith.constant 0 : index
    %c0_8 = arith.constant 0 : index
    %22 = vector.load %arg4[%c0_7, %c0_8] : memref<1x32xf32, #tpu.memory_space<vmem>>, vector<1x32xf32>
    %23 = vector.broadcast %22 : vector<1x32xf32> to vector<16x32xf32>
    %24 = arith.addf %21, %23 : vector<16x32xf32>
    %25 = arith.truncf %24 : vector<16x32xf32> to vector<16x32xbf16>
    %c0_9 = arith.constant 0 : index
    %c0_10 = arith.constant 0 : index
    %26 = vector.load %arg5[%c0_9, %c0_10] : memref<32x128xbf16, #tpu.memory_space<vmem>>, vector<32x128xbf16>
    %cst_11 = arith.constant dense<0.000000e+00> : vector<16x128xf32>
    %27 = tpu.matmul %25, %26, %cst_11 {dimension_numbers = #tpu.dot_dimension_numbers<[1], [0], [0], [1], [0, 0, 1, 1], [], []>} : vector<16x32xbf16>, vector<32x128xbf16>, vector<16x128xf32> -> vector<16x128xf32>
    %c0_12 = arith.constant 0 : index
    %c0_13 = arith.constant 0 : index
    %28 = vector.load %arg6[%c0_12, %c0_13] : memref<1x128xf32, #tpu.memory_space<vmem>>, vector<1x128xf32>
    %29 = vector.broadcast %28 : vector<1x128xf32> to vector<16x128xf32>
    %30 = arith.addf %27, %29 : vector<16x128xf32>
    %cst_14 = arith.constant -1.702000e+00 : f32
    %31 = vector.broadcast %cst_14 : f32 to vector<16x128xf32>
    %32 = arith.mulf %31, %30 : vector<16x128xf32>
    %33 = math.exp %32 : vector<16x128xf32>
    %cst_15 = arith.constant 1.000000e+00 : f32
    %34 = vector.broadcast %cst_15 : f32 to vector<16x128xf32>
    %35 = arith.addf %34, %33 : vector<16x128xf32>
    %cst_16 = arith.constant 1.000000e+00 : f32
    %36 = vector.broadcast %cst_16 : f32 to vector<16x128xf32>
    %37 = arith.divf %36, %35 : vector<16x128xf32>
    %38 = arith.mulf %30, %37 : vector<16x128xf32>
    %39 = arith.truncf %38 : vector<16x128xf32> to vector<16x128xbf16>
    %c0_17 = arith.constant 0 : index
    %c0_18 = arith.constant 0 : index
    %40 = vector.load %arg7[%c0_17, %c0_18] : memref<16x128xbf16, #tpu.memory_space<vmem>>, vector<16x128xbf16>
    tpu.vector_store %arg7[%c0_17, %c0_18], %39 {strides = array<i32>} : memref<16x128xbf16, #tpu.memory_space<vmem>>, vector<16x128xbf16>,
    return
  }
  func.func @transform_0(%arg0: i32, %arg1: i32) -> (i32, i32) {
    %c0_i32 = arith.constant 0 : i32
    %c0_i32_0 = arith.constant 0 : i32
    return %arg0, %c0_i32 : i32, i32
  }
  func.func @transform_1(%arg0: i32, %arg1: i32) -> (i32, i32) {
    %c0_i32 = arith.constant 0 : i32
    %c0_i32_0 = arith.constant 0 : i32
    %c0_i32_1 = arith.constant 0 : i32
    return %c0_i32, %c0_i32_0 : i32, i32
  }
  func.func @transform_2(%arg0: i32, %arg1: i32) -> (i32, i32) {
    %c0_i32 = arith.constant 0 : i32
    %c0_i32_0 = arith.constant 0 : i32
    %c0_i32_1 = arith.constant 0 : i32
    return %c0_i32, %c0_i32_0 : i32, i32
  }
  func.func @transform_3(%arg0: i32, %arg1: i32) -> (i32, i32) {
    %c0_i32 = arith.constant 0 : i32
    %c0_i32_0 = arith.constant 0 : i32
    return %c0_i32, %arg1 : i32, i32
  }
  func.func @transform_4(%arg0: i32, %arg1: i32) -> (i32, i32) {
    %c0_i32 = arith.constant 0 : i32
    %c0_i32_0 = arith.constant 0 : i32
    return %c0_i32, %arg1 : i32, i32
  }
  func.func @transform_5(%arg0: i32, %arg1: i32) -> (i32, i32) {
    %c0_i32 = arith.constant 0 : i32
    return %arg0, %arg1 : i32, i32
  }
}

module attributes {stable_mosaic.version = 11 : i64} {
  func.func @kernel(%arg0: i32, %arg1: i32, %arg2: memref<2x32xf32, #tpu.memory_space<vmem>>, %arg3: memref<1x32xf32, #tpu.memory_space<vmem>>, %arg4: memref<1x32xf32, #tpu.memory_space<vmem>>, %arg5: memref<32x16xf32, #tpu.memory_space<vmem>>, %arg6: memref<2x16xf32, #tpu.memory_space<vmem>>) attributes {dimension_semantics = [#tpu.dimension_semantics<parallel>, #tpu.dimension_semantics<parallel>], iteration_bounds = array<i64: 1, 1>, scalar_prefetch = 0 : i64, scratch_operands = 0 : i64, tpu.core_type = #tpu.core_type<tc>, window_params = [{transform_indices = @transform_0, window_bounds = array<i64: 2, 32>}, {pipeline_mode = #tpu.pipeline_mode<synchronous>, transform_indices = @transform_1, window_bounds = array<i64: 1, 32>}, {pipeline_mode = #tpu.pipeline_mode<synchronous>, transform_indices = @transform_2, window_bounds = array<i64: 1, 32>}, {transform_indices = @transform_3, window_bounds = array<i64: 32, 16>}, {transform_indices = @transform_4, window_bounds = array<i64: 2, 16>}]} {
    %c0 = arith.constant 0 : index
    %c0_0 = arith.constant 0 : index
    %0 = vector.load %arg2[%c0, %c0_0] : memref<2x32xf32, #tpu.memory_space<vmem>>, vector<2x32xf32>
    %cst = arith.constant dense<0.000000e+00> : vector<2xf32>
    %1 = vector.multi_reduction <add>, %0, %cst [1] : vector<2x32xf32> to vector<2xf32>
    %2 = vector.shape_cast %1 : vector<2xf32> to vector<2x1xf32>
    %cst_1 = arith.constant 3.200000e+01 : f32
    %3 = vector.broadcast %cst_1 : f32 to vector<2x1xf32>
    %4 = arith.divf %2, %3 : vector<2x1xf32>
    %5 = vector.broadcast %4 : vector<2x1xf32> to vector<2x32xf32>
    %6 = arith.subf %0, %5 : vector<2x32xf32>
    %7 = arith.mulf %6, %6 : vector<2x32xf32>
    %cst_2 = arith.constant dense<0.000000e+00> : vector<2xf32>
    %8 = vector.multi_reduction <add>, %7, %cst_2 [1] : vector<2x32xf32> to vector<2xf32>
    %9 = vector.shape_cast %8 : vector<2xf32> to vector<2x1xf32>
    %cst_3 = arith.constant 3.200000e+01 : f32
    %10 = vector.broadcast %cst_3 : f32 to vector<2x1xf32>
    %11 = arith.divf %9, %10 : vector<2x1xf32>
    %12 = vector.broadcast %4 : vector<2x1xf32> to vector<2x32xf32>
    %13 = arith.subf %0, %12 : vector<2x32xf32>
    %cst_4 = arith.constant 9.99999974E-6 : f32
    %14 = vector.broadcast %cst_4 : f32 to vector<2x1xf32>
    %15 = arith.addf %11, %14 : vector<2x1xf32>
    %16 = math.rsqrt %15 : vector<2x1xf32>
    %17 = vector.broadcast %16 : vector<2x1xf32> to vector<2x32xf32>
    %18 = arith.mulf %13, %17 : vector<2x32xf32>
    %c0_5 = arith.constant 0 : index
    %c0_6 = arith.constant 0 : index
    %19 = vector.load %arg3[%c0_5, %c0_6] : memref<1x32xf32, #tpu.memory_space<vmem>>, vector<1x32xf32>
    %20 = vector.broadcast %19 : vector<1x32xf32> to vector<2x32xf32>
    %21 = arith.mulf %18, %20 : vector<2x32xf32>
    %c0_7 = arith.constant 0 : index
    %c0_8 = arith.constant 0 : index
    %22 = vector.load %arg4[%c0_7, %c0_8] : memref<1x32xf32, #tpu.memory_space<vmem>>, vector<1x32xf32>
    %23 = vector.broadcast %22 : vector<1x32xf32> to vector<2x32xf32>
    %24 = arith.addf %21, %23 : vector<2x32xf32>
    %c0_9 = arith.constant 0 : index
    %c0_10 = arith.constant 0 : index
    %25 = vector.load %arg5[%c0_9, %c0_10] : memref<32x16xf32, #tpu.memory_space<vmem>>, vector<32x16xf32>
    %cst_11 = arith.constant dense<0.000000e+00> : vector<2x16xf32>
    %26 = tpu.matmul %24, %25, %cst_11 {dimension_numbers = #tpu.dot_dimension_numbers<[1], [0], [0], [1], [0, 0, 1, 1], [], []>} : vector<2x32xf32>, vector<32x16xf32>, vector<2x16xf32> -> vector<2x16xf32>
    %c0_12 = arith.constant 0 : index
    %c0_13 = arith.constant 0 : index
    %27 = vector.load %arg6[%c0_12, %c0_13] : memref<2x16xf32, #tpu.memory_space<vmem>>, vector<2x16xf32>
    tpu.vector_store %arg6[%c0_12, %c0_13], %26 {strides = array<i32>} : memref<2x16xf32, #tpu.memory_space<vmem>>, vector<2x16xf32>,
    return
  }
  func.func @transform_0(%arg0: i32, %arg1: i32) -> (i32, i32) {
    %c0_i32 = arith.constant 0 : i32
    %c0_i32_0 = arith.constant 0 : i32
    return %arg0, %c0_i32 : i32, i32
  }
  func.func @transform_1(%arg0: i32, %arg1: i32) -> (i32, i32) {
    %c0_i32 = arith.constant 0 : i32
    %c0_i32_0 = arith.constant 0 : i32
    %c0_i32_1 = arith.constant 0 : i32
    return %c0_i32, %c0_i32_0 : i32, i32
  }
  func.func @transform_2(%arg0: i32, %arg1: i32) -> (i32, i32) {
    %c0_i32 = arith.constant 0 : i32
    %c0_i32_0 = arith.constant 0 : i32
    %c0_i32_1 = arith.constant 0 : i32
    return %c0_i32, %c0_i32_0 : i32, i32
  }
  func.func @transform_3(%arg0: i32, %arg1: i32) -> (i32, i32) {
    %c0_i32 = arith.constant 0 : i32
    %c0_i32_0 = arith.constant 0 : i32
    return %c0_i32, %arg1 : i32, i32
  }
  func.func @transform_4(%arg0: i32, %arg1: i32) -> (i32, i32) {
    %c0_i32 = arith.constant 0 : i32
    return %arg0, %arg1 : i32, i32
  }
}

module attributes {stable_mosaic.version = 11 : i64} {
  func.func @_attn_kernel_packed(%arg0: i32, %arg1: memref<1x8x96xbf16, #tpu.memory_space<vmem>>, %arg2: memref<1x8x32xbf16, #tpu.memory_space<vmem>>) attributes {dimension_semantics = [#tpu.dimension_semantics<parallel>], iteration_bounds = array<i64: 2>, scalar_prefetch = 0 : i64, scratch_operands = 0 : i64, tpu.core_type = #tpu.core_type<tc>, window_params = [{transform_indices = @transform_0, window_bounds = array<i64: 1, 8, 96>}, {transform_indices = @transform_1, window_bounds = array<i64: 1, 8, 32>}]} {
    %0 = tpu.iota {dimensions = array<i32: 1>} : vector<8x8xi32>
    %c8_i32 = arith.constant 8 : i32
    %1 = vector.broadcast %c8_i32 : i32 to vector<8x8xi32>
    %2 = arith.cmpi slt, %0, %1 : vector<8x8xi32>
    %3 = tpu.iota {dimensions = array<i32: 0>} : vector<8x8xi32>
    %4 = arith.cmpi sle, %0, %3 : vector<8x8xi32>
    %5 = arith.andi %2, %4 : vector<8x8xi1>
    %c0 = arith.constant 0 : index
    %c0_0 = arith.constant 0 : index
    %c0_1 = arith.constant 0 : index
    %6 = vector.load %arg1[%c0, %c0_0, %c0_1] : memref<1x8x96xbf16, #tpu.memory_space<vmem>>, vector<1x8x8xbf16>
    %7 = vector.shape_cast %6 : vector<1x8x8xbf16> to vector<8x8xbf16>
    %c0_2 = arith.constant 0 : index
    %c0_3 = arith.constant 0 : index
    %c32 = arith.constant 32 : index
    %8 = vector.load %arg1[%c0_2, %c0_3, %c32] : memref<1x8x96xbf16, #tpu.memory_space<vmem>>, vector<1x8x8xbf16>
    %9 = vector.shape_cast %8 : vector<1x8x8xbf16> to vector<8x8xbf16>
    %c0_4 = arith.constant 0 : index
    %c0_5 = arith.constant 0 : index
    %c64 = arith.constant 64 : index
    %10 = vector.load %arg1[%c0_4, %c0_5, %c64] : memref<1x8x96xbf16, #tpu.memory_space<vmem>>, vector<1x8x8xbf16>
    %11 = vector.shape_cast %10 : vector<1x8x8xbf16> to vector<8x8xbf16>
    %cst = arith.constant dense<0.000000e+00> : vector<8x8xf32>
    %12 = tpu.matmul %7, %9, %cst {dimension_numbers = #tpu.dot_dimension_numbers<[1], [1], [0], [0], [0, 0, 1, 0], [], []>} : vector<8x8xbf16>, vector<8x8xbf16>, vector<8x8xf32> -> vector<8x8xf32>
    %cst_6 = arith.constant -1.000000e+30 : f32
    %13 = vector.broadcast %cst_6 : f32 to vector<8x8xf32>
    %14 = arith.select %5, %12, %13 : vector<8x8xi1>, vector<8x8xf32>
    %cst_7 = arith.constant dense<0xFF800000> : vector<8xf32>
    %15 = vector.multi_reduction <maximumf>, %14, %cst_7 [1] : vector<8x8xf32> to vector<8xf32>
    %16 = vector.shape_cast %15 : vector<8xf32> to vector<8x1xf32>
    %17 = vector.broadcast %16 : vector<8x1xf32> to vector<8x8xf32>
    %18 = arith.subf %14, %17 : vector<8x8xf32>
    %19 = math.exp %18 : vector<8x8xf32>
    %cst_8 = arith.constant dense<0.000000e+00> : vector<8xf32>
    %20 = vector.multi_reduction <add>, %19, %cst_8 [1] : vector<8x8xf32> to vector<8xf32>
    %21 = vector.shape_cast %20 : vector<8xf32> to vector<8x1xf32>
    %22 = tpu.reciprocal %21 {approx = true} : vector<8x1xf32> -> vector<8x1xf32>
    %23 = arith.truncf %19 : vector<8x8xf32> to vector<8x8xbf16>
    %cst_9 = arith.constant dense<0.000000e+00> : vector<8x8xf32>
    %24 = tpu.matmul %23, %11, %cst_9 {dimension_numbers = #tpu.dot_dimension_numbers<[1], [0], [0], [1], [0, 0, 1, 1], [], []>} : vector<8x8xbf16>, vector<8x8xbf16>, vector<8x8xf32> -> vector<8x8xf32>
    %25 = vector.broadcast %22 : vector<8x1xf32> to vector<8x8xf32>
    %26 = arith.mulf %24, %25 : vector<8x8xf32>
    %27 = arith.truncf %26 : vector<8x8xf32> to vector<8x8xbf16>
    %c0_10 = arith.constant 0 : index
    %c0_11 = arith.constant 0 : index
    %c0_12 = arith.constant 0 : index
    %28 = vector.load %arg2[%c0_10, %c0_11, %c0_12] : memref<1x8x32xbf16, #tpu.memory_space<vmem>>, vector<1x8x8xbf16>
    %29 = vector.shape_cast %28 : vector<1x8x8xbf16> to vector<8x8xbf16>
    %30 = vector.shape_cast %27 : vector<8x8xbf16> to vector<1x8x8xbf16>
    tpu.vector_store %arg2[%c0_10, %c0_11, %c0_12], %30 {strides = array<i32>} : memref<1x8x32xbf16, #tpu.memory_space<vmem>>, vector<1x8x8xbf16>,
    %c0_13 = arith.constant 0 : index
    %c0_14 = arith.constant 0 : index
    %c8 = arith.constant 8 : index
    %31 = vector.load %arg1[%c0_13, %c0_14, %c8] : memref<1x8x96xbf16, #tpu.memory_space<vmem>>, vector<1x8x8xbf16>
    %32 = vector.shape_cast %31 : vector<1x8x8xbf16> to vector<8x8xbf16>
    %c0_15 = arith.constant 0 : index
    %c0_16 = arith.constant 0 : index
    %c40 = arith.constant 40 : index
    %33 = vector.load %arg1[%c0_15, %c0_16, %c40] : memref<1x8x96xbf16, #tpu.memory_space<vmem>>, vector<1x8x8xbf16>
    %34 = vector.shape_cast %33 : vector<1x8x8xbf16> to vector<8x8xbf16>
    %c0_17 = arith.constant 0 : index
    %c0_18 = arith.constant 0 : index
    %c72 = arith.constant 72 : index
    %35 = vector.load %arg1[%c0_17, %c0_18, %c72] : memref<1x8x96xbf16, #tpu.memory_space<vmem>>, vector<1x8x8xbf16>
    %36 = vector.shape_cast %35 : vector<1x8x8xbf16> to vector<8x8xbf16>
    %cst_19 = arith.constant dense<0.000000e+00> : vector<8x8xf32>
    %37 = tpu.matmul %32, %34, %cst_19 {dimension_numbers = #tpu.dot_dimension_numbers<[1], [1], [0], [0], [0, 0, 1, 0], [], []>} : vector<8x8xbf16>, vector<8x8xbf16>, vector<8x8xf32> -> vector<8x8xf32>
    %cst_20 = arith.constant -1.000000e+30 : f32
    %38 = vector.broadcast %cst_20 : f32 to vector<8x8xf32>
    %39 = arith.select %5, %37, %38 : vector<8x8xi1>, vector<8x8xf32>
    %cst_21 = arith.constant dense<0xFF800000> : vector<8xf32>
    %40 = vector.multi_reduction <maximumf>, %39, %cst_21 [1] : vector<8x8xf32> to vector<8xf32>
    %41 = vector.shape_cast %40 : vector<8xf32> to vector<8x1xf32>
    %42 = vector.broadcast %41 : vector<8x1xf32> to vector<8x8xf32>
    %43 = arith.subf %39, %42 : vector<8x8xf32>
    %44 = math.exp %43 : vector<8x8xf32>
    %cst_22 = arith.constant dense<0.000000e+00> : vector<8xf32>
    %45 = vector.multi_reduction <add>, %44, %cst_22 [1] : vector<8x8xf32> to vector<8xf32>
    %46 = vector.shape_cast %45 : vector<8xf32> to vector<8x1xf32>
    %47 = tpu.reciprocal %46 {approx = true} : vector<8x1xf32> -> vector<8x1xf32>
    %48 = arith.truncf %44 : vector<8x8xf32> to vector<8x8xbf16>
    %cst_23 = arith.constant dense<0.000000e+00> : vector<8x8xf32>
    %49 = tpu.matmul %48, %36, %cst_23 {dimension_numbers = #tpu.dot_dimension_numbers<[1], [0], [0], [1], [0, 0, 1, 1], [], []>} : vector<8x8xbf16>, vector<8x8xbf16>, vector<8x8xf32> -> vector<8x8xf32>
    %50 = vector.broadcast %47 : vector<8x1xf32> to vector<8x8xf32>
    %51 = arith.mulf %49, %50 : vector<8x8xf32>
    %52 = arith.truncf %51 : vector<8x8xf32> to vector<8x8xbf16>
    %c0_24 = arith.constant 0 : index
    %c0_25 = arith.constant 0 : index
    %c8_26 = arith.constant 8 : index
    %53 = vector.load %arg2[%c0_24, %c0_25, %c8_26] : memref<1x8x32xbf16, #tpu.memory_space<vmem>>, vector<1x8x8xbf16>
    %54 = vector.shape_cast %53 : vector<1x8x8xbf16> to vector<8x8xbf16>
    %55 = vector.shape_cast %52 : vector<8x8xbf16> to vector<1x8x8xbf16>
    tpu.vector_store %arg2[%c0_24, %c0_25, %c8_26], %55 {strides = array<i32>} : memref<1x8x32xbf16, #tpu.memory_space<vmem>>, vector<1x8x8xbf16>,
    %c0_27 = arith.constant 0 : index
    %c0_28 = arith.constant 0 : index
    %c16 = arith.constant 16 : index
    %56 = vector.load %arg1[%c0_27, %c0_28, %c16] : memref<1x8x96xbf16, #tpu.memory_space<vmem>>, vector<1x8x8xbf16>
    %57 = vector.shape_cast %56 : vector<1x8x8xbf16> to vector<8x8xbf16>
    %c0_29 = arith.constant 0 : index
    %c0_30 = arith.constant 0 : index
    %c48 = arith.constant 48 : index
    %58 = vector.load %arg1[%c0_29, %c0_30, %c48] : memref<1x8x96xbf16, #tpu.memory_space<vmem>>, vector<1x8x8xbf16>
    %59 = vector.shape_cast %58 : vector<1x8x8xbf16> to vector<8x8xbf16>
    %c0_31 = arith.constant 0 : index
    %c0_32 = arith.constant 0 : index
    %c80 = arith.constant 80 : index
    %60 = vector.load %arg1[%c0_31, %c0_32, %c80] : memref<1x8x96xbf16, #tpu.memory_space<vmem>>, vector<1x8x8xbf16>
    %61 = vector.shape_cast %60 : vector<1x8x8xbf16> to vector<8x8xbf16>
    %cst_33 = arith.constant dense<0.000000e+00> : vector<8x8xf32>
    %62 = tpu.matmul %57, %59, %cst_33 {dimension_numbers = #tpu.dot_dimension_numbers<[1], [1], [0], [0], [0, 0, 1, 0], [], []>} : vector<8x8xbf16>, vector<8x8xbf16>, vector<8x8xf32> -> vector<8x8xf32>
    %cst_34 = arith.constant -1.000000e+30 : f32
    %63 = vector.broadcast %cst_34 : f32 to vector<8x8xf32>
    %64 = arith.select %5, %62, %63 : vector<8x8xi1>, vector<8x8xf32>
    %cst_35 = arith.constant dense<0xFF800000> : vector<8xf32>
    %65 = vector.multi_reduction <maximumf>, %64, %cst_35 [1] : vector<8x8xf32> to vector<8xf32>
    %66 = vector.shape_cast %65 : vector<8xf32> to vector<8x1xf32>
    %67 = vector.broadcast %66 : vector<8x1xf32> to vector<8x8xf32>
    %68 = arith.subf %64, %67 : vector<8x8xf32>
    %69 = math.exp %68 : vector<8x8xf32>
    %cst_36 = arith.constant dense<0.000000e+00> : vector<8xf32>
    %70 = vector.multi_reduction <add>, %69, %cst_36 [1] : vector<8x8xf32> to vector<8xf32>
    %71 = vector.shape_cast %70 : vector<8xf32> to vector<8x1xf32>
    %72 = tpu.reciprocal %71 {approx = true} : vector<8x1xf32> -> vector<8x1xf32>
    %73 = arith.truncf %69 : vector<8x8xf32> to vector<8x8xbf16>
    %cst_37 = arith.constant dense<0.000000e+00> : vector<8x8xf32>
    %74 = tpu.matmul %73, %61, %cst_37 {dimension_numbers = #tpu.dot_dimension_numbers<[1], [0], [0], [1], [0, 0, 1, 1], [], []>} : vector<8x8xbf16>, vector<8x8xbf16>, vector<8x8xf32> -> vector<8x8xf32>
    %75 = vector.broadcast %72 : vector<8x1xf32> to vector<8x8xf32>
    %76 = arith.mulf %74, %75 : vector<8x8xf32>
    %77 = arith.truncf %76 : vector<8x8xf32> to vector<8x8xbf16>
    %c0_38 = arith.constant 0 : index
    %c0_39 = arith.constant 0 : index
    %c16_40 = arith.constant 16 : index
    %78 = vector.load %arg2[%c0_38, %c0_39, %c16_40] : memref<1x8x32xbf16, #tpu.memory_space<vmem>>, vector<1x8x8xbf16>
    %79 = vector.shape_cast %78 : vector<1x8x8xbf16> to vector<8x8xbf16>
    %80 = vector.shape_cast %77 : vector<8x8xbf16> to vector<1x8x8xbf16>
    tpu.vector_store %arg2[%c0_38, %c0_39, %c16_40], %80 {strides = array<i32>} : memref<1x8x32xbf16, #tpu.memory_space<vmem>>, vector<1x8x8xbf16>,
    %c0_41 = arith.constant 0 : index
    %c0_42 = arith.constant 0 : index
    %c24 = arith.constant 24 : index
    %81 = vector.load %arg1[%c0_41, %c0_42, %c24] : memref<1x8x96xbf16, #tpu.memory_space<vmem>>, vector<1x8x8xbf16>
    %82 = vector.shape_cast %81 : vector<1x8x8xbf16> to vector<8x8xbf16>
    %c0_43 = arith.constant 0 : index
    %c0_44 = arith.constant 0 : index
    %c56 = arith.constant 56 : index
    %83 = vector.load %arg1[%c0_43, %c0_44, %c56] : memref<1x8x96xbf16, #tpu.memory_space<vmem>>, vector<1x8x8xbf16>
    %84 = vector.shape_cast %83 : vector<1x8x8xbf16> to vector<8x8xbf16>
    %c0_45 = arith.constant 0 : index
    %c0_46 = arith.constant 0 : index
    %c88 = arith.constant 88 : index
    %85 = vector.load %arg1[%c0_45, %c0_46, %c88] : memref<1x8x96xbf16, #tpu.memory_space<vmem>>, vector<1x8x8xbf16>
    %86 = vector.shape_cast %85 : vector<1x8x8xbf16> to vector<8x8xbf16>
    %cst_47 = arith.constant dense<0.000000e+00> : vector<8x8xf32>
    %87 = tpu.matmul %82, %84, %cst_47 {dimension_numbers = #tpu.dot_dimension_numbers<[1], [1], [0], [0], [0, 0, 1, 0], [], []>} : vector<8x8xbf16>, vector<8x8xbf16>, vector<8x8xf32> -> vector<8x8xf32>
    %cst_48 = arith.constant -1.000000e+30 : f32
    %88 = vector.broadcast %cst_48 : f32 to vector<8x8xf32>
    %89 = arith.select %5, %87, %88 : vector<8x8xi1>, vector<8x8xf32>
    %cst_49 = arith.constant dense<0xFF800000> : vector<8xf32>
    %90 = vector.multi_reduction <maximumf>, %89, %cst_49 [1] : vector<8x8xf32> to vector<8xf32>
    %91 = vector.shape_cast %90 : vector<8xf32> to vector<8x1xf32>
    %92 = vector.broadcast %91 : vector<8x1xf32> to vector<8x8xf32>
    %93 = arith.subf %89, %92 : vector<8x8xf32>
    %94 = math.exp %93 : vector<8x8xf32>
    %cst_50 = arith.constant dense<0.000000e+00> : vector<8xf32>
    %95 = vector.multi_reduction <add>, %94, %cst_50 [1] : vector<8x8xf32> to vector<8xf32>
    %96 = vector.shape_cast %95 : vector<8xf32> to vector<8x1xf32>
    %97 = tpu.reciprocal %96 {approx = true} : vector<8x1xf32> -> vector<8x1xf32>
    %98 = arith.truncf %94 : vector<8x8xf32> to vector<8x8xbf16>
    %cst_51 = arith.constant dense<0.000000e+00> : vector<8x8xf32>
    %99 = tpu.matmul %98, %86, %cst_51 {dimension_numbers = #tpu.dot_dimension_numbers<[1], [0], [0], [1], [0, 0, 1, 1], [], []>} : vector<8x8xbf16>, vector<8x8xbf16>, vector<8x8xf32> -> vector<8x8xf32>
    %100 = vector.broadcast %97 : vector<8x1xf32> to vector<8x8xf32>
    %101 = arith.mulf %99, %100 : vector<8x8xf32>
    %102 = arith.truncf %101 : vector<8x8xf32> to vector<8x8xbf16>
    %c0_52 = arith.constant 0 : index
    %c0_53 = arith.constant 0 : index
    %c24_54 = arith.constant 24 : index
    %103 = vector.load %arg2[%c0_52, %c0_53, %c24_54] : memref<1x8x32xbf16, #tpu.memory_space<vmem>>, vector<1x8x8xbf16>
    %104 = vector.shape_cast %103 : vector<1x8x8xbf16> to vector<8x8xbf16>
    %105 = vector.shape_cast %102 : vector<8x8xbf16> to vector<1x8x8xbf16>
    tpu.vector_store %arg2[%c0_52, %c0_53, %c24_54], %105 {strides = array<i32>} : memref<1x8x32xbf16, #tpu.memory_space<vmem>>, vector<1x8x8xbf16>,
    return
  }
  func.func @transform_0(%arg0: i32) -> (i32, i32, i32) {
    %c0_i32 = arith.constant 0 : i32
    %c0_i32_0 = arith.constant 0 : i32
    %c0_i32_1 = arith.constant 0 : i32
    return %arg0, %c0_i32, %c0_i32_0 : i32, i32, i32
  }
  func.func @transform_1(%arg0: i32) -> (i32, i32, i32) {
    %c0_i32 = arith.constant 0 : i32
    %c0_i32_0 = arith.constant 0 : i32
    %c0_i32_1 = arith.constant 0 : i32
    return %arg0, %c0_i32, %c0_i32_0 : i32, i32, i32
  }
}

</mosaic_0001>

<bundles_post_ra>
// kernel: fwd.37
= control target key start
LH: loop header
LB: loop body
LE: loop exit
PB: predicated region body
PF: predicated region fallthrough
CT: control target
= control target key end

     0   :  { %vm23_vm0 = vcmask 261120   ;;  %v181_v15 = vmov 0.0   ;;  %vm182_vm1 = vmmov 0   ;;  %vm145_vm2 = vcmask 781312   ;;  %s245_s0 = inlined_call_operand.vmem [shape: f32[16,32], index: 0, kind: input, shape index: {}]   ;;  %s246_s3 = inlined_call_operand.vmem [shape: bf16[32,96], index: 3, kind: input, shape index: {}]   ;;  %s247_s1 = inlined_call_operand.vmem [shape: f32[1,32], index: 1, kind: input, shape index: {}]   ;;  %s248_s2 = inlined_call_operand.vmem [shape: f32[1,32], index: 2, kind: input, shape index: {}]   ;;  %s249_s4 = inlined_call_operand.vmem [shape: f32[1,96], index: 4, kind: input, shape index: {}]   ;;  %s250_s5 = inlined_call_operand.vmem [shape: bf16[16,96], index: 5, kind: output, shape index: {}]  }
   0x1   :  { %v21_v0 = vld [vmem:[%s245_s0] sm:$0xff]  ;;  %v22_v1 = vld [vmem:[%s245_s0 + $0x8] sm:$0xff]  ;;  %165 = vmatprep.subr.bf16.mxu0 %v181_v15  ;;  %169 = vmatprep.mubr.msk.bf16.mxu0 %vm182_vm1, %v181_v15 }
   0x2   :  { %v24_v2 = vsel %vm23_vm0, %v21_v0, 0.0  ;;  %v27_v3 = vsel %vm23_vm0, %v22_v1, 0.0  ;;  %v175_v14 = vld [vmem:[%s246_s3] sm:$0xff]   ;;  %v176_v16 = vld [vmem:[%s246_s3 + $0x8] sm:$0xff]  }
   0x3   :  { %25 = vadd.xlane.f32.xlu0 %v24_v2  ;;  %166 = vmatpush3.bf16.msra.mxu0 %v175_v14  ;;  %v152_v25 = vld [vmem:[%s247_s1] ss:$0 sm:$0xff] }
   0x4   :  { %167 = vmatprep.subr.bf16.mxu0 %v181_v15  ;;  %v153_v29 = vld [vmem:[%s248_s2] ss:$0 sm:$0xff] }
   0x5   :  { %v154_v34 = vld [vmem:[%s249_s4] ss:$0 sm:$0xff] }
   0x7   :  { %28 = vadd.xlane.f32.xlu0 %v27_v3  ;;  %168 = vmatpush3.bf16.msra.mxu0 %v176_v16 }
  0x90   :  { %v26_v4 = vpop.xlane.xlu0 %25 }
  0x91   :  { %v31_v5 = vmul.f32 0.03125, %v26_v4 }
  0x93   :  { %v33_v6 = vsub.f32 %v21_v0, %v31_v5 }
  0x94   :  { %v29_v7 = vpop.xlane.xlu0 %28 }
  0x95   :  { %v32_v8 = vmul.f32 0.03125, %v29_v7  ;;  %v35_v9 = vmul.f32 %v33_v6, %v33_v6 }
  0x97   :  { %v34_v10 = vsub.f32 %v22_v1, %v32_v8  ;;  %v37_v11 = vsel %vm23_vm0, %v35_v9, 0.0 }
  0x98   :  { %38 = vadd.xlane.f32.xlu1 %v37_v11 }
  0x99   :  { %v36_v12 = vmul.f32 %v34_v10, %v34_v10 }
  0x9b   :  { %v40_v13 = vsel %vm23_vm0, %v36_v12, 0.0 }
  0x9c   :  { %41 = vadd.xlane.f32.xlu1 %v40_v13 }
 0x125   :  { %v39_v17 = vpop.xlane.xlu1 %38 }
 0x126   :  { %v43_v18 = vmul.f32 0.03125, %v39_v17 }
 0x128   :  { %v45_v19 = vadd.f32 1e-05, %v43_v18 }
 0x129   :  { %v42_v20 = vpop.xlane.xlu1 %41 }
 0x12a   :  { %177 = vrsqrt.f32 %v45_v19  ;;  %v44_v21 = vmul.f32 0.03125, %v42_v20 }
 0x12c   :  { %v46_v22 = vadd.f32 1e-05, %v44_v21 }
 0x12e   :  { %179 = vrsqrt.f32 %v46_v22 }
 0x134   :  { %v178_v23 = vpop.eup %177 }
 0x135   :  { %v49_v24 = vmul.f32 %v178_v23, %v33_v6 }
 0x137   :  { %v58_v28 = vmul.f32 %v152_v25, %v49_v24 }
 0x138   :  { %v180_v26 = vpop.eup %179 }
 0x139   :  { %v50_v27 = vmul.f32 %v180_v26, %v34_v10  ;;  %v67_v31 = vadd.f32 %v153_v29, %v58_v28 }
 0x13b   :  { %v59_v30 = vmul.f32 %v152_v25, %v50_v27 }
 0x13d   :  { %v68_v32 = vadd.f32 %v153_v29, %v59_v30 }
 0x13f   :  { %v69_v33 = vpack.c.bf16 %v68_v32, %v67_v31 }
 0x141   :  { %170 = vmatmul.mubr.msk.bf16.vlgmr.msra.gmra.mrb[0].mxu0 %vm23_vm0, %v69_v33 }
 0x214   :  { %v130_v35 = vpop.f32.mrb[0].mxu0 }
 0x215   :  { %v131_v36 = vadd.f32 %v154_v34, %v130_v35  ;;  %v171_v37 = vpop.f32.mrb[1].mxu0 }
 0x216   :  { %v133_v38 = vpop.f32.mrb[2].mxu0 }
 0x217   :  { %v160_v39 = vpack.c.bf16 %v131_v36, %v131_v36  ;;  %v134_v40 = vadd.f32 %v154_v34, %v133_v38  ;;  %v172_v41 = vpop.f32.mrb[3].mxu0 }
 0x219   :  { %146 = vst.msk [vmem:[%s250_s5] sm:$0xf] %vm145_vm2, %v160_v39  ;;  %v161_v42 = vpack.c.bf16 %v134_v40, %v134_v40 }
 0x21b   :  { %147 = vst.msk [vmem:[%s250_s5 + $0x4] sm:$0xf] %vm145_vm2, %v161_v42 }

// kernel: fwd.36
= control target key start
LH: loop header
LB: loop body
LE: loop exit
PB: predicated region body
PF: predicated region fallthrough
CT: control target
= control target key end

     0   :  { %vm16_vm0 = vcmask 261120   ;;  %s118_s0 = inlined_call_operand.vmem [shape: f32[16,32], index: 0, kind: input, shape index: {}]   ;;  %s119_s1 = inlined_call_operand.vmem [shape: f32[1,32], index: 1, kind: input, shape index: {}]   ;;  %s120_s2 = inlined_call_operand.vmem [shape: f32[1,32], index: 2, kind: input, shape index: {}]   ;;  %s121_s3 = inlined_call_operand.vmem [shape: f32[16,32], index: 3, kind: output, shape index: {}]  }
   0x1   :  { %v14_v0 = vld [vmem:[%s118_s0] sm:$0xff]  ;;  %v15_v1 = vld [vmem:[%s118_s0 + $0x8] sm:$0xff] }
   0x2   :  { %v17_v2 = vsel %vm16_vm0, %v14_v0, 0.0  ;;  %v20_v3 = vsel %vm16_vm0, %v15_v1, 0.0  ;;  %v68_v21 = vld [vmem:[%s119_s1] ss:$0 sm:$0xff] }
   0x3   :  { %18 = vadd.xlane.f32.xlu0 %v17_v2  ;;  %v69_v23 = vld [vmem:[%s120_s2] ss:$0 sm:$0xff] }
   0x7   :  { %21 = vadd.xlane.f32.xlu0 %v20_v3 }
  0x90   :  { %v19_v4 = vpop.xlane.xlu0 %18 }
  0x91   :  { %v24_v5 = vmul.f32 0.03125, %v19_v4 }
  0x93   :  { %v26_v6 = vsub.f32 %v14_v0, %v24_v5 }
  0x94   :  { %v22_v7 = vpop.xlane.xlu0 %21 }
  0x95   :  { %v25_v8 = vmul.f32 0.03125, %v22_v7  ;;  %v28_v9 = vmul.f32 %v26_v6, %v26_v6 }
  0x97   :  { %v27_v10 = vsub.f32 %v15_v1, %v25_v8  ;;  %v30_v11 = vsel %vm16_vm0, %v28_v9, 0.0 }
  0x98   :  { %31 = vadd.xlane.f32.xlu1 %v30_v11 }
  0x99   :  { %v29_v12 = vmul.f32 %v27_v10, %v27_v10 }
  0x9b   :  { %v33_v13 = vsel %vm16_vm0, %v29_v12, 0.0 }
  0x9c   :  { %34 = vadd.xlane.f32.xlu1 %v33_v13 }
 0x125   :  { %v32_v14 = vpop.xlane.xlu1 %31 }
 0x126   :  { %v36_v15 = vmul.f32 0.03125, %v32_v14 }
 0x128   :  { %v38_v16 = vadd.f32 1e-05, %v36_v15 }
 0x129   :  { %v35_v17 = vpop.xlane.xlu1 %34 }
 0x12a   :  { %70 = vrsqrt.f32 %v38_v16  ;;  %v37_v18 = vmul.f32 0.03125, %v35_v17 }
 0x12c   :  { %v39_v19 = vadd.f32 1e-05, %v37_v18 }
 0x12e   :  { %72 = vrsqrt.f32 %v39_v19 }
 0x134   :  { %v71_v20 = vpop.eup %70 }
 0x135   :  { %v42_v22 = vmul.f32 %v71_v20, %v26_v6 }
 0x137   :  { %v51_v24 = vmul.f32 %v68_v21, %v42_v22 }
 0x138   :  { %v73_v25 = vpop.eup %72 }
 0x139   :  { %v60_v26 = vadd.f32 %v69_v23, %v51_v24  ;;  %v43_v27 = vmul.f32 %v73_v25, %v27_v10 }
 0x13b   :  { %62 = vst.msk [vmem:[%s121_s3] sm:$0xff] %vm16_vm0, %v60_v26  ;;  %v52_v28 = vmul.f32 %v68_v21, %v43_v27 }
 0x13d   :  { %v61_v29 = vadd.f32 %v69_v23, %v52_v28 }
 0x13f   :  { %63 = vst.msk [vmem:[%s121_s3 + $0x8] sm:$0xff] %vm16_vm0, %v61_v29 }

// kernel: fwd.35
= control target key start
LH: loop header
LB: loop body
LE: loop exit
PB: predicated region body
PF: predicated region fallthrough
CT: control target
= control target key end

     0   :  { %v195_v0 = vmov 0   ;;  %vm115_vm0 = vcmask 523264   ;;  %vm159_vm1 = vcmask 261120   ;;  %s253_s1 = inlined_call_operand.vmem [shape: bf16[192,32], index: 1, kind: input, shape index: {}]   ;;  %s254_s0 = inlined_call_operand.vmem [shape: bf16[8,192], index: 0, kind: input, shape index: {}]   ;;  %s255_s2 = inlined_call_operand.vmem [shape: f32[8,32], index: 2, kind: output, shape index: {}]  }
   0x1   :  { %119 = vmatprep.subr.bf16.mxu0 %v195_v0  ;;  %v181_v1 = vld [vmem:[%s253_s1] sm:$0xff]   ;;  %v182_v2 = vld [vmem:[%s253_s1 + $0x8] sm:$0xff]   ;;  %v183_v3 = vld [vmem:[%s253_s1 + $0x10] sm:$0xff]  }
   0x2   :  { %120 = vmatpush1.bf16.msra.mxu0 %v181_v1  ;;  %v184_v4 = vld [vmem:[%s253_s1 + $0x18] sm:$0xff]   ;;  %v12_v5 = vld [vmem:[%s254_s0] sm:$0xff]  ;;  %v186_v8 = vld [vmem:[%s253_s1 + $0x28] sm:$0xff]  }
   0x3   :  { %121 = vmatprep.subr.bf16.mxu0 %v195_v0  ;;  %v166_v6 = vcombine.high %v12_v5, %v12_v5  ;;  %v185_v7 = vld [vmem:[%s253_s1 + $0x20] sm:$0xff]   ;;  %v187_v9 = vld [vmem:[%s253_s1 + $0x30] sm:$0xff]   ;;  %v188_v10 = vld [vmem:[%s253_s1 + $0x38] sm:$0xff]   ;;  %v165_v15 = vcombine.low %v12_v5, %v12_v5 }
   0x4   :  { %v189_v11 = vld [vmem:[%s253_s1 + $0x40] sm:$0xff]   ;;  %v190_v12 = vld [vmem:[%s253_s1 + $0x48] sm:$0xff]   ;;  %v191_v13 = vld [vmem:[%s253_s1 + $0x50] sm:$0xff]  }
   0x5   :  { %179 = vmatprep.mubr.msk.bf16.mxu0 %vm115_vm0, %v166_v6  ;;  %v192_v14 = vld [vmem:[%s253_s1 + $0x58] sm:$0xff]  }
   0x6   :  { %122 = vmatpush1.bf16.msra.mxu0 %v182_v2 }
   0x7   :  { %123 = vmatprep.subr.bf16.mxu0 %v195_v0 }
   0xa   :  { %124 = vmatpush1.bf16.msra.mxu0 %v183_v3 }
   0xb   :  { %125 = vmatprep.subr.bf16.mxu0 %v195_v0 }
   0xe   :  { %126 = vmatpush1.bf16.msra.mxu0 %v184_v4 }
   0xf   :  { %127 = vmatprep.subr.bf16.mxu0 %v195_v0 }
  0x12   :  { %128 = vmatpush1.bf16.msra.mxu0 %v185_v7 }
  0x13   :  { %129 = vmatprep.subr.bf16.mxu0 %v195_v0 }
  0x16   :  { %130 = vmatpush1.bf16.msra.mxu0 %v186_v8 }
  0x17   :  { %131 = vmatprep.subr.bf16.mxu0 %v195_v0 }
  0x1a   :  { %132 = vmatpush1.bf16.msra.mxu0 %v187_v9 }
  0x1b   :  { %133 = vmatprep.subr.bf16.mxu0 %v195_v0 }
  0x1e   :  { %134 = vmatpush1.bf16.msra.mxu0 %v188_v10 }
  0x1f   :  { %135 = vmatprep.subr.bf16.mxu0 %v195_v0 }
  0x22   :  { %136 = vmatpush1.bf16.msra.mxu0 %v189_v11 }
  0x23   :  { %137 = vmatprep.subr.bf16.mxu0 %v195_v0 }
  0x26   :  { %138 = vmatpush1.bf16.msra.mxu0 %v190_v12 }
  0x27   :  { %139 = vmatprep.subr.bf16.mxu0 %v195_v0 }
  0x2a   :  { %140 = vmatpush1.bf16.msra.mxu0 %v191_v13 }
  0x2b   :  { %141 = vmatprep.subr.bf16.mxu0 %v195_v0 }
  0x2e   :  { %142 = vmatpush1.bf16.msra.mxu0 %v192_v14 }
  0x31   :  { %152 = vmatmul.mubr.bf16.vlgmr.msra.gmra.mrb[0].mxu0 %v165_v15 }
 0x104   :  { %v153_v16 = vpop.f32.mrb[0].mxu0 }
 0x105   :  { %160 = vst.msk [vmem:[%s255_s2] sm:$0xff] %vm159_vm1, %v153_v16  ;;  %v155_v17 = vpop.f32.mrb[1].mxu0 }
 0x106   :  { %v156_v18 = vpop.f32.mrb[2].mxu0 }
 0x107   :  { %v157_v19 = vpop.f32.mrb[3].mxu0 }

// kernel: fwd.38
= control target key start
LH: loop header
LB: loop body
LE: loop exit
PB: predicated region body
PF: predicated region fallthrough
CT: control target
= control target key end

     0   :  { %s828_s6 = smov 0   ;;  %s935_s0 = inlined_call_operand.vmem [shape: bf16[2,8,96], index: 0, kind: input, shape index: {}]   ;;  %s936_s1 = inlined_call_operand.vmem [shape: bf16[2,8,32], index: 1, kind: output, shape index: {}]  }
   0x1 LB: > { %s659_s7 = sadd.s32 4294967295, %s800_s6   ;;  %p663_p0 = scmp.ge.s32.totalorder %s800_s6, 1  ;;  %s800_s6 = sphi %s828_s6, %s11_s6  }
   0x2   : > { %p86_p1 = scmp.lt.s32.totalorder %s800_s6, 3 }
   0x4   : > { %p87_p2 = pnand %p663_p0, %p86_p1 }
   0x5   : > { %p104_p3 = scmp.lt.s32.totalorder (!%p87_p2), %s659_s7, 1  ;;  %v802_v0 = vmov (!%p87_p2), 0.0   ;;  %vm803_vm0 = vmmov (!%p87_p2), 0   ;;  %s804_s12 = smov (!%p87_p2), 96   ;;  %vm122_vm1 = vcmask (!%p87_p2), 64512   ;;  %v113_v8 = vlaneseq (!%p87_p2) }
   0x6   : > { %90 = sbr.rel (%p87_p2) target bundleno = 1244 (0x4dc), region = 24  ;;  %702 = vmatprep.subr.bf16.mxu0 (!%p87_p2), %v802_v0  ;;  %704 = vmatprep.mubr.msk.bf16.mxu0 (!%p87_p2), %vm803_vm0, %v802_v0  ;;  %s805_s13 = smov (!%p87_p2), 64   ;;  %vm186_vm3 = vcmask (!%p87_p2), 1043456   ;;  %vm232_vm4 = vcmask (!%p87_p2), 60416   ;;  %vm356_vm5 = vcmask (!%p87_p2), 126016   ;;  %vm480_vm6 = vcmask (!%p87_p2), 191616  }
   0x7   : > { %708 = vmatprep.subr.bf16.mxu1 (!%p87_p2), %v802_v0  ;;  %710 = vmatprep.mubr.msk.bf16.mxu1 (!%p87_p2), %vm803_vm0, %v802_v0  ;;  %s806_s14 = smov (!%p87_p2), 88   ;;  %s807_s15 = smov (!%p87_p2), 120   ;;  %v863_v9 = vand.u32 (!%p87_p2), 127, %v113_v8  ;;  %vm604_vm7 = vcmask (!%p87_p2), 257216  }
   0x8   : > { %s808_s16 = smov (!%p87_p2), 80   ;;  %s809_s17 = smov (!%p87_p2), 112  }
   0x9   : > { %s810_s18 = smov (!%p87_p2), 72   ;;  %s811_s19 = smov (!%p87_p2), 104   ;;  %vm115_vm2 = vcmp.lt.s32.totalorder (!%p87_p2), %v863_v9, 5 }
   0xa   : > { %s812_s20 = smov (!%p87_p2), 56   ;;  %s813_s21 = smov (!%p87_p2), 48  }
   0xb   : > { %s814_s22 = smov (!%p87_p2), 40   ;;  %s815_s26 = smov (!%p87_p2), 8  }
   0xc   : > { %s816_s27 = smov (!%p87_p2), 16   ;;  %s817_s28 = smov (!%p87_p2), 24  }
   0xd   : > { %s938_s7 = smov (!%p104_p3, %s659_s7), 1 }
   0xe   : > { %s664_s8 = sshll.u32 %s938_s7, 2 }
   0xf   : > { %s107_s11 = scalar_lea.vmem %s935_s0, %s664_s8  ;;  %s926_s25 = scalar_lea.vmem %s936_s1, %s664_s8 }
  0x10   : > { %v116_v1 = vld [vmem:[%s107_s11] sm:$0xf] }
  0x11   : > { %v666_v2 = vcombine.low %v116_v1, %v116_v1  ;;  %v775_v5 = vld [vmem:[%s107_s11] ss:$0 sps:$4 sm:$0xff]  }
  0x12   : > { %v855_v6 = vld [vmem:[%s107_s11] ss:$0 sps:$4 sm:$0xff]  }
  0x13   : > { %120 = vrot.lane.b32.xlu0 %v666_v2, %s804_s12  ;;  %181 = vrot.lane.b32.xlu1 %v666_v2, %s805_s13  ;;  %v859_v7 = vld [vmem:[%s107_s11] ss:$0 sps:$4 sm:$0xff]  }
  0x17   : > { %240 = vrot.lane.b32.xlu1 %v775_v5, %s806_s14 }
  0x1b   : > { %238 = vrot.lane.b32.xlu1 %v775_v5, %s807_s15 }
  0x1f   : > { %364 = vrot.lane.b32.xlu1 %v855_v6, %s808_s16 }
  0x23   : > { %362 = vrot.lane.b32.xlu1 %v855_v6, %s809_s17 }
  0x27   : > { %488 = vrot.lane.b32.xlu1 %v859_v7, %s810_s18 }
  0x2b   : > { %486 = vrot.lane.b32.xlu1 %v859_v7, %s811_s19 }
  0x85   : > { %v121_v3 = vpop.permute.xlu0 %120  ;;  %v182_v16 = vpop.permute.xlu1 %181 }
  0x86   : > { %v127_v4 = vsel %vm122_vm1, %v121_v3, 0  ;;  %v188_v17 = vsel %vm186_vm3, %v182_v16, 0 }
  0x87   : > { %703 = vmatpush3.bf16.xpose.msra.mxu0 %v127_v4  ;;  %709 = vmatpush3.bf16.msra.mxu1 %v188_v17 }
  0x88   : > { %720 = vmatprep.subr.bf16.mxu0 %v802_v0  ;;  %714 = vmatprep.subr.bf16.mxu1 %v802_v0 }
  0x89   : > { %v241_v21 = vpop.permute.xlu1 %240 }
  0x8a   : > { %v246_v24 = vsel %vm122_vm1, %v241_v21, 0 }
  0x8d   : > { %v239_v22 = vpop.permute.xlu1 %238 }
  0x8e   : > { %705 = vmatmul.mubr.msk.bf16.vlgmr.msra.gmra.mrb[0].mxu0 %vm122_vm1, %v116_v1 }
  0x8f   : > { %722 = vmatprep.mubr.msk.bf16.mxu0 %vm803_vm0, %v802_v0 }
  0x91   : > { %v365_v26 = vpop.permute.xlu1 %364 }
  0x92   : > { %v370_v28 = vsel %vm122_vm1, %v365_v26, 0 }
  0x95   : > { %v363_v27 = vpop.permute.xlu1 %362 }
  0x99   : > { %v489_v29 = vpop.permute.xlu1 %488 }
  0x9a   : > { %v494_v30 = vsel %vm122_vm1, %v489_v29, 0 }
  0x9d   : > { %v487_v31 = vpop.permute.xlu1 %486 }
 0x161   : > { %v163_v10 = vpop.f32.mrb[0].mxu0 }
 0x162   : > { %v169_v11 = vsel %vm115_vm2, %v163_v10, -1e+30  ;;  %v706_v12 = vpop.f32.mrb[1].mxu0 }
 0x163   : > { %v166_v13 = vpop.f32.mrb[2].mxu0  ;;  %v170_v14 = vsel %vm122_vm1, %v169_v11, -inf }
 0x164   : > { %171 = vmax.xlane.f32.xlu0 %v170_v14  ;;  %v707_v15 = vpop.f32.mrb[3].mxu0 }
 0x17a   : > { %300 = vrot.lane.b32.xlu0 %v775_v5, %s812_s20 }
 0x1f1   : > { %v172_v18 = vpop.xlane.xlu0 %171 }
 0x1f2   : > { %v173_v19 = vsub.f32 %v169_v11, %v172_v18 }
 0x1f4   : > { %v174_v20 = vmul.f32 1.442695, %v173_v19 }
 0x1f5   : > { %v301_v32 = vpop.permute.xlu0 %300 }
 0x1f6   : > { %778 = vpow2.f32 %v174_v20  ;;  %v306_v33 = vsel %vm186_vm3, %v301_v32, 0 }
 0x1f7   : > { %721 = vmatpush3.bf16.msra.mxu0 %v306_v33 }
 0x1f8   : > { %732 = vmatprep.subr.bf16.mxu0 %v802_v0 }
 0x200   : > { %v871_v23 = vpop.eup %778 }
 0x201   : > { %v180_v25 = vpack.c.bf16 %v871_v23, %v871_v23  ;;  %v176_v15 = vsel %vm122_vm1, %v871_v23, 0.0 }
 0x203   : > { %711 = vmatmul.mubr.msk.bf16.vlgmr.msra.gmra.mrb[0].mxu1 %vm122_vm1, %v180_v25 }
 0x204   : > { %715 = vmatpush3.bf16.xpose.msra.mxu1 %v246_v24  ;;  %716 = vmatprep.mubr.msk.bf16.mxu1 %vm803_vm0, %v802_v0 }
 0x205   : > { %726 = vmatprep.subr.bf16.mxu1 %v802_v0 }
 0x20b   : > { %717 = vmatmul.mubr.msk.bf16.vlgmr.msra.gmra.mrb[4].mxu1 %vm122_vm1, %v239_v22 }
 0x20c   : > { %727 = vmatpush3.bf16.xpose.msra.mxu1 %v370_v28  ;;  %728 = vmatprep.mubr.msk.bf16.mxu1 %vm803_vm0, %v802_v0 }
 0x20d   : > { %738 = vmatprep.subr.bf16.mxu1 %v802_v0 }
 0x213   : > { %729 = vmatmul.mubr.msk.bf16.vlgmr.msra.gmra.mrb[8].mxu1 %vm122_vm1, %v363_v27 }
 0x214   : > { %739 = vmatpush3.bf16.xpose.msra.mxu1 %v494_v30  ;;  %740 = vmatprep.mubr.msk.bf16.mxu1 %vm803_vm0, %v802_v0 }
 0x21b   : > { %741 = vmatmul.mubr.msk.bf16.vlgmr.msra.gmra.mrb[12].mxu1 %vm122_vm1, %v487_v31 }
 0x2d6   : > { %v892_v34 = vpop.f32.mrb[0].mxu1 }
 0x2d7   : > { %v712_v35 = vpop.f32.mrb[1].mxu1 }
 0x2d8   : > { %v227_v36 = vpop.f32.mrb[2].mxu1 }
 0x2d9   : > { %v713_v37 = vpop.f32.mrb[3].mxu1 }
 0x2de   : > { %v282_v38 = vpop.f32.mrb[4].mxu1 }
 0x2df   : > { %v288_v39 = vsel %vm115_vm2, %v282_v38, -1e+30  ;;  %v718_v40 = vpop.f32.mrb[5].mxu1 }
 0x2e0   : > { %v285_v41 = vpop.f32.mrb[6].mxu1  ;;  %v289_v42 = vsel %vm122_vm1, %v288_v39, -inf }
 0x2e1   : > { %290 = vmax.xlane.f32.xlu1 %v289_v42  ;;  %v719_v43 = vpop.f32.mrb[7].mxu1 }
 0x2e6   : > { %v406_v44 = vpop.f32.mrb[8].mxu1 }
 0x2e7   : > { %v412_v45 = vsel %vm115_vm2, %v406_v44, -1e+30  ;;  %v730_v46 = vpop.f32.mrb[9].mxu1 }
 0x2e8   : > { %v409_v47 = vpop.f32.mrb[10].mxu1  ;;  %v413_v48 = vsel %vm122_vm1, %v412_v45, -inf }
 0x2e9   : > { %414 = vmax.xlane.f32.xlu0 %v413_v48  ;;  %v731_v49 = vpop.f32.mrb[11].mxu1 }
 0x2ee   : > { %v530_v50 = vpop.f32.mrb[12].mxu1 }
 0x2ef   : > { %v536_v51 = vsel %vm115_vm2, %v530_v50, -1e+30  ;;  %v742_v52 = vpop.f32.mrb[13].mxu1 }
 0x2f0   : > { %v533_v53 = vpop.f32.mrb[14].mxu1  ;;  %v537_v54 = vsel %vm122_vm1, %v536_v51, -inf }
 0x2f1   : > { %538 = vmax.xlane.f32.xlu0 %v537_v54  ;;  %v743_v55 = vpop.f32.mrb[15].mxu1 }
 0x2f2   : > { %424 = vrot.lane.b32.xlu1 %v855_v6, %s813_s21 }
 0x307   : > { %548 = vrot.lane.b32.xlu0 %v859_v7, %s814_s22 }
 0x36e   : > { %v291_v56 = vpop.xlane.xlu1 %290 }
 0x36f   : > { %v292_v57 = vsub.f32 %v288_v39, %v291_v56 }
 0x371   : > { %v293_v58 = vmul.f32 1.442695, %v292_v57 }
 0x372   : > { %v425_v62 = vpop.permute.xlu1 %424 }
 0x373   : > { %780 = vpow2.f32 %v293_v58  ;;  %v430_v1 = vsel %vm186_vm3, %v425_v62, 0 }
 0x376   : > { %v415_v59 = vpop.xlane.xlu0 %414 }
 0x377   : > { %v416_v60 = vsub.f32 %v412_v45, %v415_v59 }
 0x379   : > { %v417_v61 = vmul.f32 1.442695, %v416_v60 }
 0x37b   : > { %782 = vpow2.f32 %v417_v61 }
 0x37d   : > { %v781_v63 = vpop.eup %780 }
 0x37e   : > { %v539_v2 = vpop.xlane.xlu0 %538  ;;  %v295_v3 = vsel %vm122_vm1, %v781_v63, 0.0  ;;  %v299_v4 = vpack.c.bf16 %v781_v63, %v781_v63 }
 0x37f   : > { %v540_v5 = vsub.f32 %v536_v51, %v539_v2  ;;  %296 = vadd.xlane.f32.xlu0 %v295_v3 }
 0x380   : > { %723 = vmatmul.mubr.msk.bf16.vlgmr.msra.gmra.mrb[4].mxu0 %vm122_vm1, %v299_v4 }
 0x381   : > { %v541_v6 = vmul.f32 1.442695, %v540_v5  ;;  %733 = vmatpush3.bf16.msra.mxu0 %v430_v1  ;;  %734 = vmatprep.mubr.msk.bf16.mxu0 %vm803_vm0, %v802_v0 }
 0x382   : > { %744 = vmatprep.subr.bf16.mxu0 %v802_v0  ;;  %v549_v7 = vpop.permute.xlu0 %548 }
 0x383   : > { %784 = vpow2.f32 %v541_v6  ;;  %v554_v9 = vsel %vm186_vm3, %v549_v7, 0 }
 0x385   : > { %v783_v8 = vpop.eup %782 }
 0x386   : > { %v419_v10 = vsel %vm122_vm1, %v783_v8, 0.0  ;;  %v423_v11 = vpack.c.bf16 %v783_v8, %v783_v8 }
 0x387   : > { %420 = vadd.xlane.f32.xlu1 %v419_v10 }
 0x388   : > { %735 = vmatmul.mubr.msk.bf16.vlgmr.msra.gmra.mrb[8].mxu0 %vm122_vm1, %v423_v11 }
 0x389   : > { %745 = vmatpush3.bf16.msra.mxu0 %v554_v9  ;;  %746 = vmatprep.mubr.msk.bf16.mxu0 %vm803_vm0, %v802_v0 }
 0x38d   : > { %v785_v12 = vpop.eup %784 }
 0x38e   : > { %v543_v13 = vsel %vm122_vm1, %v785_v12, 0.0  ;;  %v547_v14 = vpack.c.bf16 %v785_v12, %v785_v12 }
 0x38f   : > { %544 = vadd.xlane.f32.xlu0 %v543_v13 }
 0x390   : > { %747 = vmatmul.mubr.msk.bf16.vlgmr.msra.gmra.mrb[12].mxu0 %vm122_vm1, %v547_v14 }
 0x393   : > { %177 = vadd.xlane.f32.xlu0 %v176_v15 }
 0x40c   : > { %v297_v16 = vpop.xlane.xlu0 %296 }
 0x414   : > { %v421_v21 = vpop.xlane.xlu1 %420 }
 0x41c   : > { %v545_v17 = vpop.xlane.xlu0 %544 }
 0x420   : > { %v178_v18 = vpop.xlane.xlu0 %177 }
 0x421   : > { %786 = vrcp.f32 %v178_v18 }
 0x422   : > { %788 = vrcp.f32 %v297_v16 }
 0x423   : > { %790 = vrcp.f32 %v421_v21 }
 0x424   : > { %792 = vrcp.f32 %v545_v17 }
 0x42b   : > { %v787_v19 = vpop.eup %786 }
 0x42c   : > { %v230_v20 = vmul.f32 %v787_v19, %v892_v34  ;;  %v789_v22 = vpop.eup %788 }
 0x42d   : > { %v791_v29 = vpop.eup %790 }
 0x42e   : > { %v231_v0 = vpack.c.bf16 %v230_v20, %v230_v20  ;;  %v793_v36 = vpop.eup %792 }
 0x430   : > { %233 = vst.msk [vmem:[%s926_s25] sm:$0xf] %vm232_vm4, %v231_v0 }
 0x453   : > { %v342_v23 = vpop.f32.mrb[4].mxu0 }
 0x454   : > { %v348_v24 = vmul.f32 %v789_v22, %v342_v23  ;;  %v724_v25 = vpop.f32.mrb[5].mxu0 }
 0x455   : > { %v345_v26 = vpop.f32.mrb[6].mxu0 }
 0x456   : > { %v683_v27 = vpack.c.bf16 %v348_v24, %v348_v24  ;;  %v725_v28 = vpop.f32.mrb[7].mxu0 }
 0x458   : > { %353 = vrot.lane.b32.xlu0 %v683_v27, %s815_s26 }
 0x45b   : > { %v466_v30 = vpop.f32.mrb[8].mxu0 }
 0x45c   : > { %v472_v31 = vmul.f32 %v791_v29, %v466_v30  ;;  %v736_v32 = vpop.f32.mrb[9].mxu0 }
 0x45d   : > { %v469_v33 = vpop.f32.mrb[10].mxu0 }
 0x45e   : > { %v684_v34 = vpack.c.bf16 %v472_v31, %v472_v31  ;;  %v737_v35 = vpop.f32.mrb[11].mxu0 }
 0x460   : > { %477 = vrot.lane.b32.xlu1 %v684_v34, %s816_s27 }
 0x463   : > { %v590_v37 = vpop.f32.mrb[12].mxu0 }
 0x464   : > { %v596_v38 = vmul.f32 %v793_v36, %v590_v37  ;;  %v748_v39 = vpop.f32.mrb[13].mxu0 }
 0x465   : > { %v593_v40 = vpop.f32.mrb[14].mxu0 }
 0x466   : > { %v685_v41 = vpack.c.bf16 %v596_v38, %v596_v38  ;;  %v749_v42 = vpop.f32.mrb[15].mxu0 }
 0x468   : > { %601 = vrot.lane.b32.xlu0 %v685_v41, %s817_s28 }
 0x4ca   : > { %v354_v43 = vpop.permute.xlu0 %353 }
 0x4cb   : > { %357 = vst.msk [vmem:[%s926_s25] sm:$0xf] %vm356_vm5, %v354_v43 }
 0x4d2   : > { %v478_v44 = vpop.permute.xlu1 %477 }
 0x4d3   : > { %481 = vst.msk [vmem:[%s926_s25] sm:$0xf] %vm480_vm6, %v478_v44 }
 0x4da   : > { %v602_v45 = vpop.permute.xlu0 %601 }
 0x4db   : > { %605 = vst.msk [vmem:[%s926_s25] sm:$0xf] %vm604_vm7, %v602_v45 }
 0x4dc PF: > { %s11_s6 = sadd.s32 1, %s800_s6  }
 0x4dd   : > { %p8_p4 = scmp.ge.s32.totalorder %s11_s6, 4  }
 0x4df   :  { %10 = sbr.rel (!%p8_p4) target bundleno = 1 (0x1), region = 54 }

// kernel: fwd.39
= control target key start
LH: loop header
LB: loop body
LE: loop exit
PB: predicated region body
PF: predicated region fallthrough
CT: control target
= control target key end

     0   :  { %v124_v0 = vmov 0.0   ;;  %vm125_vm0 = vmmov 0   ;;  %vm48_vm1 = vcmask 261120   ;;  %s178_s1 = inlined_call_operand.vmem [shape: bf16[32,32], index: 1, kind: input, shape index: {}]   ;;  %s179_s0 = inlined_call_operand.vmem [shape: bf16[16,32], index: 0, kind: input, shape index: {}]   ;;  %s180_s2 = inlined_call_operand.vmem [shape: f32[1,32], index: 2, kind: input, shape index: {}]   ;;  %s181_s3 = inlined_call_operand.vmem [shape: f32[16,32], index: 3, kind: input, shape index: {}]   ;;  %s182_s4 = inlined_call_operand.vmem [shape: f32[16,32], index: 4, kind: output, shape index: {}]  }
   0x1   :  { %111 = vmatprep.subr.bf16.mxu0 %v124_v0  ;;  %v121_v1 = vld [vmem:[%s178_s1] sm:$0xff]   ;;  %115 = vmatprep.mubr.msk.bf16.mxu0 %vm125_vm0, %v124_v0  ;;  %v122_v2 = vld [vmem:[%s178_s1 + $0x8] sm:$0xff]  }
   0x2   :  { %112 = vmatpush3.bf16.msra.mxu0 %v121_v1  ;;  %v123_v3 = vld [vmem:[%s179_s0] sm:$0xff]   ;;  %v94_v10 = vld [vmem:[%s181_s3 + $0x8] sm:$0xff] }
   0x3   :  { %113 = vmatprep.subr.bf16.mxu0 %v124_v0  ;;  %v103_v4 = vld [vmem:[%s180_s2] ss:$0 sm:$0xff] }
   0x4   :  { %v93_v6 = vld [vmem:[%s181_s3] sm:$0xff] }
   0x6   :  { %114 = vmatpush3.bf16.msra.mxu0 %v122_v2 }
   0x9   :  { %116 = vmatmul.mubr.msk.bf16.vlgmr.msra.gmra.mrb[0].mxu0 %vm48_vm1, %v123_v3 }
  0xdc   :  { %v86_v5 = vpop.f32.mrb[0].mxu0 }
  0xdd   :  { %v87_v7 = vadd.f32 %v103_v4, %v86_v5  ;;  %v117_v8 = vpop.f32.mrb[1].mxu0 }
  0xde   :  { %v89_v9 = vpop.f32.mrb[2].mxu0 }
  0xdf   :  { %v95_v11 = vadd.f32 %v93_v6, %v87_v7  ;;  %v90_v12 = vadd.f32 %v103_v4, %v89_v9  ;;  %v118_v13 = vpop.f32.mrb[3].mxu0 }
  0xe1   :  { %97 = vst.msk [vmem:[%s182_s4] sm:$0xff] %vm48_vm1, %v95_v11  ;;  %v96_v14 = vadd.f32 %v94_v10, %v90_v12 }
  0xe3   :  { %98 = vst.msk [vmem:[%s182_s4 + $0x8] sm:$0xff] %vm48_vm1, %v96_v14 }

// kernel: fwd.41
= control target key start
LH: loop header
LB: loop body
LE: loop exit
PB: predicated region body
PF: predicated region fallthrough
CT: control target
= control target key end

     0   :  { %v199_v0 = vmov 0.0   ;;  %vm200_vm0 = vmmov 0   ;;  %vm142_vm1 = vcmask 261120   ;;  %s268_s1 = inlined_call_operand.vmem [shape: bf16[128,32], index: 1, kind: input, shape index: {}]   ;;  %s269_s0 = inlined_call_operand.vmem [shape: bf16[16,128], index: 0, kind: input, shape index: {}]   ;;  %s270_s2 = inlined_call_operand.vmem [shape: f32[1,32], index: 2, kind: input, shape index: {}]   ;;  %s271_s3 = inlined_call_operand.vmem [shape: f32[16,32], index: 3, kind: input, shape index: {}]   ;;  %s272_s4 = inlined_call_operand.vmem [shape: f32[16,32], index: 4, kind: output, shape index: {}]  }
   0x1   :  { %168 = vmatprep.subr.bf16.mxu0 %v199_v0  ;;  %v190_v1 = vld [vmem:[%s268_s1] sm:$0xff]   ;;  %184 = vmatprep.mubr.msk.bf16.mxu0 %vm200_vm0, %v199_v0  ;;  %v191_v2 = vld [vmem:[%s268_s1 + $0x8] sm:$0xff]   ;;  %v192_v3 = vld [vmem:[%s268_s1 + $0x10] sm:$0xff]  }
   0x2   :  { %169 = vmatpush3.bf16.msra.mxu0 %v190_v1  ;;  %v193_v4 = vld [vmem:[%s268_s1 + $0x18] sm:$0xff]   ;;  %v194_v5 = vld [vmem:[%s268_s1 + $0x20] sm:$0xff]   ;;  %v195_v6 = vld [vmem:[%s268_s1 + $0x28] sm:$0xff]  }
   0x3   :  { %170 = vmatprep.subr.bf16.mxu0 %v199_v0  ;;  %v196_v7 = vld [vmem:[%s268_s1 + $0x30] sm:$0xff]   ;;  %v197_v8 = vld [vmem:[%s268_s1 + $0x38] sm:$0xff]   ;;  %v198_v9 = vld [vmem:[%s269_s0] sm:$0xff]  }
   0x4   :  { %v149_v10 = vld [vmem:[%s270_s2] ss:$0 sm:$0xff]  ;;  %v139_v16 = vld [vmem:[%s271_s3 + $0x8] sm:$0xff] }
   0x5   :  { %v138_v12 = vld [vmem:[%s271_s3] sm:$0xff] }
   0x6   :  { %171 = vmatpush3.bf16.msra.mxu0 %v191_v2 }
   0x7   :  { %172 = vmatprep.subr.bf16.mxu0 %v199_v0 }
   0xa   :  { %173 = vmatpush3.bf16.msra.mxu0 %v192_v3 }
   0xb   :  { %174 = vmatprep.subr.bf16.mxu0 %v199_v0 }
   0xe   :  { %175 = vmatpush3.bf16.msra.mxu0 %v193_v4 }
   0xf   :  { %176 = vmatprep.subr.bf16.mxu0 %v199_v0 }
  0x12   :  { %177 = vmatpush3.bf16.msra.mxu0 %v194_v5 }
  0x13   :  { %178 = vmatprep.subr.bf16.mxu0 %v199_v0 }
  0x16   :  { %179 = vmatpush3.bf16.msra.mxu0 %v195_v6 }
  0x17   :  { %180 = vmatprep.subr.bf16.mxu0 %v199_v0 }
  0x1a   :  { %181 = vmatpush3.bf16.msra.mxu0 %v196_v7 }
  0x1b   :  { %182 = vmatprep.subr.bf16.mxu0 %v199_v0 }
  0x1e   :  { %183 = vmatpush3.bf16.msra.mxu0 %v197_v8 }
  0x21   :  { %185 = vmatmul.mubr.bf16.vlgmr.msra.gmra.mrb[0].mxu0 %v198_v9 }
  0xf4   :  { %v131_v11 = vpop.f32.mrb[0].mxu0 }
  0xf5   :  { %v132_v13 = vadd.f32 %v149_v10, %v131_v11  ;;  %v186_v14 = vpop.f32.mrb[1].mxu0 }
  0xf6   :  { %v134_v15 = vpop.f32.mrb[2].mxu0 }
  0xf7   :  { %v140_v17 = vadd.f32 %v138_v12, %v132_v13  ;;  %v135_v18 = vadd.f32 %v149_v10, %v134_v15  ;;  %v187_v19 = vpop.f32.mrb[3].mxu0 }
  0xf9   :  { %143 = vst.msk [vmem:[%s272_s4] sm:$0xff] %vm142_vm1, %v140_v17  ;;  %v141_v20 = vadd.f32 %v139_v16, %v135_v18 }
  0xfb   :  { %144 = vst.msk [vmem:[%s272_s4 + $0x8] sm:$0xff] %vm142_vm1, %v141_v20 }

// kernel: fwd.40
= control target key start
LH: loop header
LB: loop body
LE: loop exit
PB: predicated region body
PF: predicated region fallthrough
CT: control target
= control target key end

     0   :  { %vm23_vm0 = vcmask 261120   ;;  %v207_v15 = vmov 0.0   ;;  %vm208_vm1 = vmmov 0   ;;  %s268_s0 = inlined_call_operand.vmem [shape: f32[16,32], index: 0, kind: input, shape index: {}]   ;;  %s269_s3 = inlined_call_operand.vmem [shape: bf16[32,128], index: 3, kind: input, shape index: {}]   ;;  %s270_s1 = inlined_call_operand.vmem [shape: f32[1,32], index: 1, kind: input, shape index: {}]   ;;  %s271_s2 = inlined_call_operand.vmem [shape: f32[1,32], index: 2, kind: input, shape index: {}]   ;;  %s272_s4 = inlined_call_operand.vmem [shape: f32[1,128], index: 4, kind: input, shape index: {}]   ;;  %s273_s5 = inlined_call_operand.vmem [shape: bf16[16,128], index: 5, kind: output, shape index: {}]  }
   0x1   :  { %v21_v0 = vld [vmem:[%s268_s0] sm:$0xff]  ;;  %v22_v1 = vld [vmem:[%s268_s0 + $0x8] sm:$0xff]  ;;  %183 = vmatprep.subr.bf16.mxu0 %v207_v15  ;;  %187 = vmatprep.mubr.msk.bf16.mxu0 %vm208_vm1, %v207_v15 }
   0x2   :  { %v24_v2 = vsel %vm23_vm0, %v21_v0, 0.0  ;;  %v27_v3 = vsel %vm23_vm0, %v22_v1, 0.0  ;;  %v193_v14 = vld [vmem:[%s269_s3] sm:$0xff]   ;;  %v194_v16 = vld [vmem:[%s269_s3 + $0x8] sm:$0xff]  }
   0x3   :  { %25 = vadd.xlane.f32.xlu0 %v24_v2  ;;  %184 = vmatpush3.bf16.msra.mxu0 %v193_v14  ;;  %v165_v25 = vld [vmem:[%s270_s1] ss:$0 sm:$0xff] }
   0x4   :  { %185 = vmatprep.subr.bf16.mxu0 %v207_v15  ;;  %v166_v29 = vld [vmem:[%s271_s2] ss:$0 sm:$0xff] }
   0x5   :  { %v167_v34 = vld [vmem:[%s272_s4] ss:$0 sm:$0xff] }
   0x7   :  { %28 = vadd.xlane.f32.xlu0 %v27_v3  ;;  %186 = vmatpush3.bf16.msra.mxu0 %v194_v16 }
  0x90   :  { %v26_v4 = vpop.xlane.xlu0 %25 }
  0x91   :  { %v31_v5 = vmul.f32 0.03125, %v26_v4 }
  0x93   :  { %v33_v6 = vsub.f32 %v21_v0, %v31_v5 }
  0x94   :  { %v29_v7 = vpop.xlane.xlu0 %28 }
  0x95   :  { %v32_v8 = vmul.f32 0.03125, %v29_v7  ;;  %v35_v9 = vmul.f32 %v33_v6, %v33_v6 }
  0x97   :  { %v34_v10 = vsub.f32 %v22_v1, %v32_v8  ;;  %v37_v11 = vsel %vm23_vm0, %v35_v9, 0.0 }
  0x98   :  { %38 = vadd.xlane.f32.xlu1 %v37_v11 }
  0x99   :  { %v36_v12 = vmul.f32 %v34_v10, %v34_v10 }
  0x9b   :  { %v40_v13 = vsel %vm23_vm0, %v36_v12, 0.0 }
  0x9c   :  { %41 = vadd.xlane.f32.xlu1 %v40_v13 }
 0x125   :  { %v39_v17 = vpop.xlane.xlu1 %38 }
 0x126   :  { %v43_v18 = vmul.f32 0.03125, %v39_v17 }
 0x128   :  { %v45_v19 = vadd.f32 1e-05, %v43_v18 }
 0x129   :  { %v42_v20 = vpop.xlane.xlu1 %41 }
 0x12a   :  { %195 = vrsqrt.f32 %v45_v19  ;;  %v44_v21 = vmul.f32 0.03125, %v42_v20 }
 0x12c   :  { %v46_v22 = vadd.f32 1e-05, %v44_v21 }
 0x12e   :  { %197 = vrsqrt.f32 %v46_v22 }
 0x134   :  { %v196_v23 = vpop.eup %195 }
 0x135   :  { %v49_v24 = vmul.f32 %v196_v23, %v33_v6 }
 0x137   :  { %v58_v28 = vmul.f32 %v165_v25, %v49_v24 }
 0x138   :  { %v198_v26 = vpop.eup %197 }
 0x139   :  { %v50_v27 = vmul.f32 %v198_v26, %v34_v10  ;;  %v67_v31 = vadd.f32 %v166_v29, %v58_v28 }
 0x13b   :  { %v59_v30 = vmul.f32 %v165_v25, %v50_v27 }
 0x13d   :  { %v68_v32 = vadd.f32 %v166_v29, %v59_v30 }
 0x13f   :  { %v69_v33 = vpack.c.bf16 %v68_v32, %v67_v31 }
 0x141   :  { %188 = vmatmul.mubr.msk.bf16.vlgmr.msra.gmra.mrb[0].mxu0 %vm23_vm0, %v69_v33 }
 0x214   :  { %v130_v35 = vpop.f32.mrb[0].mxu0 }
 0x215   :  { %v131_v36 = vadd.f32 %v167_v34, %v130_v35  ;;  %v189_v37 = vpop.f32.mrb[1].mxu0 }
 0x216   :  { %v133_v38 = vpop.f32.mrb[2].mxu0 }
 0x217   :  { %v137_v39 = vmul.f32 -1.702, %v131_v36  ;;  %v134_v40 = vadd.f32 %v167_v34, %v133_v38  ;;  %v190_v41 = vpop.f32.mrb[3].mxu0 }
 0x219   :  { %v139_v42 = vmul.f32 1.442695, %v137_v39  ;;  %v138_v43 = vmul.f32 -1.702, %v134_v40 }
 0x21b   :  { %199 = vpow2.f32 %v139_v42  ;;  %v141_v44 = vmul.f32 1.442695, %v138_v43 }
 0x21d   :  { %201 = vpow2.f32 %v141_v44 }
 0x225   :  { %v200_v45 = vpop.eup %199 }
 0x226   :  { %v143_v46 = vadd.f32 1.0, %v200_v45 }
 0x227   :  { %v202_v47 = vpop.eup %201 }
 0x228   :  { %203 = vrcp.f32 %v143_v46  ;;  %v144_v48 = vadd.f32 1.0, %v202_v47 }
 0x22a   :  { %205 = vrcp.f32 %v144_v48 }
 0x232   :  { %v204_v49 = vpop.eup %203 }
 0x233   :  { %v149_v51 = vmul.f32 %v204_v49, %v131_v36 }
 0x234   :  { %v206_v50 = vpop.eup %205 }
 0x235   :  { %v150_v52 = vmul.f32 %v206_v50, %v134_v40 }
 0x237   :  { %v178_v53 = vpack.c.bf16 %v150_v52, %v149_v51 }
 0x239   :  { %179 = vst [vmem:[%s273_s5] sm:$0xff] %v178_v53  }

// kernel: fwd.47
= control target key start
LH: loop header
LB: loop body
LE: loop exit
PB: predicated region body
PF: predicated region fallthrough
CT: control target
= control target key end

     0   :  { %vm19_vm0 = vcmask 254976   ;;  %s261_s0 = inlined_call_operand.vmem [shape: f32[2,32], index: 0, kind: input, shape index: {}]   ;;  %s262_s1 = inlined_call_operand.vmem [shape: f32[1,32], index: 1, kind: input, shape index: {}]   ;;  %s263_s2 = inlined_call_operand.vmem [shape: f32[1,32], index: 2, kind: input, shape index: {}]   ;;  %s264_s3 = inlined_call_operand.vmem [shape: f32[32,16], index: 3, kind: input, shape index: {}]   ;;  %s265_s4 = inlined_call_operand.hbm [shape: f32[2,16], index: 4, kind: output, shape index: {}]  }
   0x1   :  { %v18_v0 = vld [vmem:[%s261_s0] sm:$0x3] }
   0x2   :  { %9 = vsyncpa [#allocation3], 0  ;;  %v20_v1 = vsel %vm19_vm0, %v18_v0, 0.0  ;;  %v50_v7 = vld [vmem:[%s264_s3] sm:$0xff]  ;;  %v51_v8 = vld [vmem:[%s264_s3 + $0x8] sm:$0xff]  ;;  %v199_v10 = vmov 0.0|0.0  }
   0x3   :  { %21 = vadd.xlane.f32.xlu0 %v20_v1  ;;  %v52_v9 = vld [vmem:[%s264_s3 + $0x10] sm:$0xff]  ;;  %163 = vmatprep.subr.bf16.mxu0 %v199_v10  ;;  %v164_v11 = vpack.c.bf16 %v51_v8, %v50_v7  ;;  %v53_v12 = vld [vmem:[%s264_s3 + $0x18] sm:$0xff]  ;;  %vm200_vm1 = vmmov 0   ;;  %v201_v13 = vmov 0.0   ;;  %v144_v19 = vld [vmem:[%s262_s1] ss:$0 sm:$0xff] }
   0x4   :  { %160 = vmatprep.mubr.msk.f32.mxu0 %vm200_vm1, %v201_v13  ;;  %v167_v14 = vpack.c.bf16 %v53_v12, %v52_v9  ;;  %v145_v21 = vld [vmem:[%s263_s2] ss:$0 sm:$0xff]  ;;  %vm54_vm2 = vcmask 261120   ;;  %s202_s3 = smov [#allocation2]   ;;  %vm128_vm3 = vcmask 123904  }
   0x5   :  { %165 = vmatpush3.bf16.msra.mxu0 %v164_v11  ;;  %s136_s28 = sshll.u32 %s202_s3, 4  ;;  %s137_s28 = int_to_ptr.vmem [resolvable:$true] %s136_s28 }
   0x6   :  { %166 = vmatprep.subr.bf16.mxu0 %v199_v10  ;;  %s175_s29 = scalar_lea.vmem %s137_s28, 32  ;;  %p180_p1 = scmp.lt.s32.totalorder %s137_s28, %s137_s28 }
   0x7   :  { %p176_p0 = scmp.ne.s32.totalorder %s137_s28, %s175_s29  ;;  %p181_p2 = scmp.lt.s32.totalorder %s175_s29, %s175_s29 }
   0x9   :  { %168 = vmatpush3.bf16.msra.mxu0 %v167_v14  ;;  %p182_p3 = por %p181_p2, %p180_p1 }
   0xb   :  { %p183_p4 = pnand %p182_p3, %p176_p0 }
  0x90   :  { %v22_v2 = vpop.xlane.xlu0 %21 }
  0x91   :  { %v24_v3 = vmul.f32 0.03125, %v22_v2 }
  0x93   :  { %v25_v4 = vsub.f32 %v18_v0, %v24_v3 }
  0x95   :  { %v26_v5 = vmul.f32 %v25_v4, %v25_v4 }
  0x97   :  { %v27_v6 = vsel %vm19_vm0, %v26_v5, 0.0 }
  0x98   :  { %28 = vadd.xlane.f32.xlu0 %v27_v6 }
 0x125   :  { %v29_v15 = vpop.xlane.xlu0 %28 }
 0x126   :  { %v30_v16 = vmul.f32 0.03125, %v29_v15 }
 0x128   :  { %v31_v17 = vadd.f32 1e-05, %v30_v16 }
 0x12a   :  { %173 = vrsqrt.f32 %v31_v17 }
 0x134   :  { %v174_v18 = vpop.eup %173 }
 0x135   :  { %v33_v20 = vmul.f32 %v174_v18, %v25_v4 }
 0x137   :  { %v41_v22 = vmul.f32 %v144_v19, %v33_v20 }
 0x139   :  { %v49_v23 = vadd.f32 %v145_v21, %v41_v22 }
 0x13b   :  { %161 = vmatmul.mubr.msk.f32.vlgmr.msra.gmra.mrb[0].mxu0 %vm54_vm2, %v49_v23 }
 0x20e   :  { %v124_v24 = vpop.f32.mrb[0].mxu0 }
 0x20f   :  { %129 = vst.msk [vmem:[#allocation2] sm:$0x3] %vm128_vm3, %v124_v24  ;;  %v162_v25 = vpop.f32.mrb[1].mxu0 }
 0x210   :  { %186 = shalt.err (!%p183_p4)
}
 0x211   :  { %s187_s30 = scalar_lea.hbm %s265_s4, 32 }
 0x212   :  { %p188_p5 = scmp.ne.s32.totalorder %s265_s4, %s187_s30  ;;  %p191_p6 = scmp.lt.u32.totalorder %s187_s30, %s265_s4 }
 0x214   :  { %p193_p7 = pnand %p191_p6, %p188_p5 }
 0x216   :  { %196 = shalt.err (!%p193_p7)
}
 0x217   :  { %139 = dma.vmem_to_hbm [thread:$0]  %s137_s28, 32, %s265_s4, [#allocation3]  }
 0x218   :  { %197 = dma.done.wait [#allocation3], 32  }
 0x219   :  { %198 = vsyncadd [#allocation3], 4294967264 }
 0x21a   :  { %143 = vsyncpa [#allocation3], 1 }

// kernel: fwd.25
= control target key start
LH: loop header
LB: loop body
LE: loop exit
PB: predicated region body
PF: predicated region fallthrough
CT: control target
= control target key end

     0   :  { %s832_s6 = smov 0   ;;  %s940_s0 = inlined_call_operand.vmem [shape: bf16[2,8,96], index: 0, kind: input, shape index: {}]   ;;  %s941_s1 = inlined_call_operand.vmem [shape: bf16[2,8,32], index: 1, kind: output, shape index: {}]  }
   0x1 LB: > { %s663_s7 = sadd.s32 4294967295, %s804_s6   ;;  %p667_p0 = scmp.ge.s32.totalorder %s804_s6, 1  ;;  %s804_s6 = sphi %s832_s6, %s11_s6  }
   0x2   : > { %p86_p1 = scmp.lt.s32.totalorder %s804_s6, 3 }
   0x4   : > { %p87_p2 = pnand %p667_p0, %p86_p1 }
   0x5   : > { %p104_p3 = scmp.lt.s32.totalorder (!%p87_p2), %s663_s7, 1  ;;  %v806_v0 = vmov (!%p87_p2), 0.0   ;;  %vm807_vm0 = vmmov (!%p87_p2), 0   ;;  %s808_s12 = smov (!%p87_p2), 96   ;;  %vm126_vm1 = vcmask (!%p87_p2), 64512   ;;  %v113_v8 = vlaneseq (!%p87_p2) }
   0x6   : > { %90 = sbr.rel (%p87_p2) target bundleno = 1244 (0x4dc), region = 24  ;;  %706 = vmatprep.subr.bf16.mxu0 (!%p87_p2), %v806_v0  ;;  %708 = vmatprep.mubr.msk.bf16.mxu0 (!%p87_p2), %vm807_vm0, %v806_v0  ;;  %s809_s13 = smov (!%p87_p2), 64   ;;  %vm190_vm5 = vcmask (!%p87_p2), 1043456   ;;  %vm236_vm6 = vcmask (!%p87_p2), 60416   ;;  %vm360_vm7 = vcmask (!%p87_p2), 126016   ;;  %vm484_vm8 = vcmask (!%p87_p2), 191616  }
   0x7   : > { %712 = vmatprep.subr.bf16.mxu1 (!%p87_p2), %v806_v0  ;;  %714 = vmatprep.mubr.msk.bf16.mxu1 (!%p87_p2), %vm807_vm0, %v806_v0  ;;  %s810_s14 = smov (!%p87_p2), 88   ;;  %s811_s15 = smov (!%p87_p2), 120   ;;  %v114_v9 = vand.u32 (!%p87_p2), 127, %v113_v8  ;;  %v117_v10 = vshrl.u32 (!%p87_p2), %v113_v8, 7  ;;  %vm608_vm9 = vcmask (!%p87_p2), 257216  }
   0x8   : > { %s812_s16 = smov (!%p87_p2), 80   ;;  %s813_s17 = smov (!%p87_p2), 112  }
   0x9   : > { %s814_s18 = smov (!%p87_p2), 72   ;;  %s815_s19 = smov (!%p87_p2), 104   ;;  %vm115_vm2 = vcmp.lt.s32.totalorder (!%p87_p2), %v114_v9, 8  ;;  %vm118_vm3 = vcmp.le.s32.totalorder (!%p87_p2), %v114_v9, %v117_v10 }
   0xa   : > { %vm867_vm4 = vmand (!%p87_p2), %vm115_vm2, %vm118_vm3  ;;  %s816_s20 = smov (!%p87_p2), 56   ;;  %s817_s21 = smov (!%p87_p2), 48  }
   0xb   : > { %s818_s22 = smov (!%p87_p2), 40   ;;  %s819_s26 = smov (!%p87_p2), 8  }
   0xc   : > { %s820_s27 = smov (!%p87_p2), 16   ;;  %s821_s28 = smov (!%p87_p2), 24  }
   0xd   : > { %s945_s7 = smov (!%p104_p3, %s663_s7), 1 }
   0xe   : > { %s668_s8 = sshll.u32 %s945_s7, 2 }
   0xf   : > { %s107_s11 = scalar_lea.vmem %s940_s0, %s668_s8  ;;  %s931_s25 = scalar_lea.vmem %s941_s1, %s668_s8 }
  0x10   : > { %v120_v1 = vld [vmem:[%s107_s11] sm:$0xf] }
  0x11   : > { %v670_v2 = vcombine.low %v120_v1, %v120_v1  ;;  %v779_v5 = vld [vmem:[%s107_s11] ss:$0 sps:$4 sm:$0xff]  }
  0x12   : > { %v859_v6 = vld [vmem:[%s107_s11] ss:$0 sps:$4 sm:$0xff]  }
  0x13   : > { %124 = vrot.lane.b32.xlu0 %v670_v2, %s808_s12  ;;  %185 = vrot.lane.b32.xlu1 %v670_v2, %s809_s13  ;;  %v863_v7 = vld [vmem:[%s107_s11] ss:$0 sps:$4 sm:$0xff]  }
  0x17   : > { %244 = vrot.lane.b32.xlu1 %v779_v5, %s810_s14 }
  0x1b   : > { %242 = vrot.lane.b32.xlu1 %v779_v5, %s811_s15 }
  0x1f   : > { %368 = vrot.lane.b32.xlu1 %v859_v6, %s812_s16 }
  0x23   : > { %366 = vrot.lane.b32.xlu1 %v859_v6, %s813_s17 }
  0x27   : > { %492 = vrot.lane.b32.xlu1 %v863_v7, %s814_s18 }
  0x2b   : > { %490 = vrot.lane.b32.xlu1 %v863_v7, %s815_s19 }
  0x85   : > { %v125_v3 = vpop.permute.xlu0 %124  ;;  %v186_v18 = vpop.permute.xlu1 %185 }
  0x86   : > { %v131_v4 = vsel %vm126_vm1, %v125_v3, 0  ;;  %v192_v19 = vsel %vm190_vm5, %v186_v18, 0 }
  0x87   : > { %707 = vmatpush3.bf16.xpose.msra.mxu0 %v131_v4  ;;  %713 = vmatpush3.bf16.msra.mxu1 %v192_v19 }
  0x88   : > { %724 = vmatprep.subr.bf16.mxu0 %v806_v0  ;;  %718 = vmatprep.subr.bf16.mxu1 %v806_v0 }
  0x89   : > { %v245_v23 = vpop.permute.xlu1 %244 }
  0x8a   : > { %v250_v26 = vsel %vm126_vm1, %v245_v23, 0 }
  0x8d   : > { %v243_v24 = vpop.permute.xlu1 %242 }
  0x8e   : > { %709 = vmatmul.mubr.msk.bf16.vlgmr.msra.gmra.mrb[0].mxu0 %vm126_vm1, %v120_v1 }
  0x8f   : > { %726 = vmatprep.mubr.msk.bf16.mxu0 %vm807_vm0, %v806_v0 }
  0x91   : > { %v369_v28 = vpop.permute.xlu1 %368 }
  0x92   : > { %v374_v30 = vsel %vm126_vm1, %v369_v28, 0 }
  0x95   : > { %v367_v29 = vpop.permute.xlu1 %366 }
  0x99   : > { %v493_v31 = vpop.permute.xlu1 %492 }
  0x9a   : > { %v498_v32 = vsel %vm126_vm1, %v493_v31, 0 }
  0x9d   : > { %v491_v33 = vpop.permute.xlu1 %490 }
 0x161   : > { %v167_v12 = vpop.f32.mrb[0].mxu0 }
 0x162   : > { %v173_v13 = vsel %vm867_vm4, %v167_v12, -1e+30  ;;  %v710_v14 = vpop.f32.mrb[1].mxu0 }
 0x163   : > { %v170_v15 = vpop.f32.mrb[2].mxu0  ;;  %v174_v16 = vsel %vm126_vm1, %v173_v13, -inf }
 0x164   : > { %175 = vmax.xlane.f32.xlu0 %v174_v16  ;;  %v711_v17 = vpop.f32.mrb[3].mxu0 }
 0x17a   : > { %304 = vrot.lane.b32.xlu0 %v779_v5, %s816_s20 }
 0x1f1   : > { %v176_v20 = vpop.xlane.xlu0 %175 }
 0x1f2   : > { %v177_v21 = vsub.f32 %v173_v13, %v176_v20 }
 0x1f4   : > { %v178_v22 = vmul.f32 1.442695, %v177_v21 }
 0x1f5   : > { %v305_v34 = vpop.permute.xlu0 %304 }
 0x1f6   : > { %782 = vpow2.f32 %v178_v22  ;;  %v310_v35 = vsel %vm190_vm5, %v305_v34, 0 }
 0x1f7   : > { %725 = vmatpush3.bf16.msra.mxu0 %v310_v35 }
 0x1f8   : > { %736 = vmatprep.subr.bf16.mxu0 %v806_v0 }
 0x200   : > { %v876_v25 = vpop.eup %782 }
 0x201   : > { %v184_v27 = vpack.c.bf16 %v876_v25, %v876_v25  ;;  %v180_v17 = vsel %vm126_vm1, %v876_v25, 0.0 }
 0x203   : > { %715 = vmatmul.mubr.msk.bf16.vlgmr.msra.gmra.mrb[0].mxu1 %vm126_vm1, %v184_v27 }
 0x204   : > { %719 = vmatpush3.bf16.xpose.msra.mxu1 %v250_v26  ;;  %720 = vmatprep.mubr.msk.bf16.mxu1 %vm807_vm0, %v806_v0 }
 0x205   : > { %730 = vmatprep.subr.bf16.mxu1 %v806_v0 }
 0x20b   : > { %721 = vmatmul.mubr.msk.bf16.vlgmr.msra.gmra.mrb[4].mxu1 %vm126_vm1, %v243_v24 }
 0x20c   : > { %731 = vmatpush3.bf16.xpose.msra.mxu1 %v374_v30  ;;  %732 = vmatprep.mubr.msk.bf16.mxu1 %vm807_vm0, %v806_v0 }
 0x20d   : > { %742 = vmatprep.subr.bf16.mxu1 %v806_v0 }
 0x213   : > { %733 = vmatmul.mubr.msk.bf16.vlgmr.msra.gmra.mrb[8].mxu1 %vm126_vm1, %v367_v29 }
 0x214   : > { %743 = vmatpush3.bf16.xpose.msra.mxu1 %v498_v32  ;;  %744 = vmatprep.mubr.msk.bf16.mxu1 %vm807_vm0, %v806_v0 }
 0x21b   : > { %745 = vmatmul.mubr.msk.bf16.vlgmr.msra.gmra.mrb[12].mxu1 %vm126_vm1, %v491_v33 }
 0x2d6   : > { %v897_v36 = vpop.f32.mrb[0].mxu1 }
 0x2d7   : > { %v716_v37 = vpop.f32.mrb[1].mxu1 }
 0x2d8   : > { %v231_v38 = vpop.f32.mrb[2].mxu1 }
 0x2d9   : > { %v717_v39 = vpop.f32.mrb[3].mxu1 }
 0x2de   : > { %v286_v40 = vpop.f32.mrb[4].mxu1 }
 0x2df   : > { %v292_v41 = vsel %vm867_vm4, %v286_v40, -1e+30  ;;  %v722_v42 = vpop.f32.mrb[5].mxu1 }
 0x2e0   : > { %v289_v43 = vpop.f32.mrb[6].mxu1  ;;  %v293_v44 = vsel %vm126_vm1, %v292_v41, -inf }
 0x2e1   : > { %294 = vmax.xlane.f32.xlu1 %v293_v44  ;;  %v723_v45 = vpop.f32.mrb[7].mxu1 }
 0x2e6   : > { %v410_v46 = vpop.f32.mrb[8].mxu1 }
 0x2e7   : > { %v416_v47 = vsel %vm867_vm4, %v410_v46, -1e+30  ;;  %v734_v48 = vpop.f32.mrb[9].mxu1 }
 0x2e8   : > { %v413_v49 = vpop.f32.mrb[10].mxu1  ;;  %v417_v50 = vsel %vm126_vm1, %v416_v47, -inf }
 0x2e9   : > { %418 = vmax.xlane.f32.xlu0 %v417_v50  ;;  %v735_v51 = vpop.f32.mrb[11].mxu1 }
 0x2ee   : > { %v534_v52 = vpop.f32.mrb[12].mxu1 }
 0x2ef   : > { %v540_v53 = vsel %vm867_vm4, %v534_v52, -1e+30  ;;  %v746_v54 = vpop.f32.mrb[13].mxu1 }
 0x2f0   : > { %v537_v55 = vpop.f32.mrb[14].mxu1  ;;  %v541_v56 = vsel %vm126_vm1, %v540_v53, -inf }
 0x2f1   : > { %542 = vmax.xlane.f32.xlu0 %v541_v56  ;;  %v747_v57 = vpop.f32.mrb[15].mxu1 }
 0x2f2   : > { %428 = vrot.lane.b32.xlu1 %v859_v6, %s817_s21 }
 0x307   : > { %552 = vrot.lane.b32.xlu0 %v863_v7, %s818_s22 }
 0x36e   : > { %v295_v58 = vpop.xlane.xlu1 %294 }
 0x36f   : > { %v296_v59 = vsub.f32 %v292_v41, %v295_v58 }
 0x371   : > { %v297_v60 = vmul.f32 1.442695, %v296_v59 }
 0x372   : > { %v429_v1 = vpop.permute.xlu1 %428 }
 0x373   : > { %784 = vpow2.f32 %v297_v60  ;;  %v434_v3 = vsel %vm190_vm5, %v429_v1, 0 }
 0x376   : > { %v419_v61 = vpop.xlane.xlu0 %418 }
 0x377   : > { %v420_v62 = vsub.f32 %v416_v47, %v419_v61 }
 0x379   : > { %v421_v63 = vmul.f32 1.442695, %v420_v62 }
 0x37b   : > { %786 = vpow2.f32 %v421_v63 }
 0x37d   : > { %v785_v2 = vpop.eup %784 }
 0x37e   : > { %v543_v4 = vpop.xlane.xlu0 %542  ;;  %v299_v5 = vsel %vm126_vm1, %v785_v2, 0.0  ;;  %v303_v8 = vpack.c.bf16 %v785_v2, %v785_v2 }
 0x37f   : > { %v544_v6 = vsub.f32 %v540_v53, %v543_v4  ;;  %300 = vadd.xlane.f32.xlu0 %v299_v5 }
 0x380   : > { %727 = vmatmul.mubr.msk.bf16.vlgmr.msra.gmra.mrb[4].mxu0 %vm126_vm1, %v303_v8 }
 0x381   : > { %v545_v7 = vmul.f32 1.442695, %v544_v6  ;;  %737 = vmatpush3.bf16.msra.mxu0 %v434_v3  ;;  %738 = vmatprep.mubr.msk.bf16.mxu0 %vm807_vm0, %v806_v0 }
 0x382   : > { %748 = vmatprep.subr.bf16.mxu0 %v806_v0  ;;  %v553_v9 = vpop.permute.xlu0 %552 }
 0x383   : > { %788 = vpow2.f32 %v545_v7  ;;  %v558_v11 = vsel %vm190_vm5, %v553_v9, 0 }
 0x385   : > { %v787_v10 = vpop.eup %786 }
 0x386   : > { %v423_v12 = vsel %vm126_vm1, %v787_v10, 0.0  ;;  %v427_v13 = vpack.c.bf16 %v787_v10, %v787_v10 }
 0x387   : > { %424 = vadd.xlane.f32.xlu1 %v423_v12 }
 0x388   : > { %739 = vmatmul.mubr.msk.bf16.vlgmr.msra.gmra.mrb[8].mxu0 %vm126_vm1, %v427_v13 }
 0x389   : > { %749 = vmatpush3.bf16.msra.mxu0 %v558_v11  ;;  %750 = vmatprep.mubr.msk.bf16.mxu0 %vm807_vm0, %v806_v0 }
 0x38d   : > { %v789_v14 = vpop.eup %788 }
 0x38e   : > { %v547_v15 = vsel %vm126_vm1, %v789_v14, 0.0  ;;  %v551_v16 = vpack.c.bf16 %v789_v14, %v789_v14 }
 0x38f   : > { %548 = vadd.xlane.f32.xlu0 %v547_v15 }
 0x390   : > { %751 = vmatmul.mubr.msk.bf16.vlgmr.msra.gmra.mrb[12].mxu0 %vm126_vm1, %v551_v16 }
 0x393   : > { %181 = vadd.xlane.f32.xlu0 %v180_v17 }
 0x40c   : > { %v301_v18 = vpop.xlane.xlu0 %300 }
 0x414   : > { %v425_v23 = vpop.xlane.xlu1 %424 }
 0x41c   : > { %v549_v19 = vpop.xlane.xlu0 %548 }
 0x420   : > { %v182_v20 = vpop.xlane.xlu0 %181 }
 0x421   : > { %790 = vrcp.f32 %v182_v20 }
 0x422   : > { %792 = vrcp.f32 %v301_v18 }
 0x423   : > { %794 = vrcp.f32 %v425_v23 }
 0x424   : > { %796 = vrcp.f32 %v549_v19 }
 0x42b   : > { %v791_v21 = vpop.eup %790 }
 0x42c   : > { %v234_v22 = vmul.f32 %v791_v21, %v897_v36  ;;  %v793_v24 = vpop.eup %792 }
 0x42d   : > { %v795_v31 = vpop.eup %794 }
 0x42e   : > { %v235_v0 = vpack.c.bf16 %v234_v22, %v234_v22  ;;  %v797_v38 = vpop.eup %796 }
 0x430   : > { %237 = vst.msk [vmem:[%s931_s25] sm:$0xf] %vm236_vm6, %v235_v0 }
 0x453   : > { %v346_v25 = vpop.f32.mrb[4].mxu0 }
 0x454   : > { %v352_v26 = vmul.f32 %v793_v24, %v346_v25  ;;  %v728_v27 = vpop.f32.mrb[5].mxu0 }
 0x455   : > { %v349_v28 = vpop.f32.mrb[6].mxu0 }
 0x456   : > { %v687_v29 = vpack.c.bf16 %v352_v26, %v352_v26  ;;  %v729_v30 = vpop.f32.mrb[7].mxu0 }
 0x458   : > { %357 = vrot.lane.b32.xlu0 %v687_v29, %s819_s26 }
 0x45b   : > { %v470_v32 = vpop.f32.mrb[8].mxu0 }
 0x45c   : > { %v476_v33 = vmul.f32 %v795_v31, %v470_v32  ;;  %v740_v34 = vpop.f32.mrb[9].mxu0 }
 0x45d   : > { %v473_v35 = vpop.f32.mrb[10].mxu0 }
 0x45e   : > { %v688_v36 = vpack.c.bf16 %v476_v33, %v476_v33  ;;  %v741_v37 = vpop.f32.mrb[11].mxu0 }
 0x460   : > { %481 = vrot.lane.b32.xlu1 %v688_v36, %s820_s27 }
 0x463   : > { %v594_v39 = vpop.f32.mrb[12].mxu0 }
 0x464   : > { %v600_v40 = vmul.f32 %v797_v38, %v594_v39  ;;  %v752_v41 = vpop.f32.mrb[13].mxu0 }
 0x465   : > { %v597_v42 = vpop.f32.mrb[14].mxu0 }
 0x466   : > { %v689_v43 = vpack.c.bf16 %v600_v40, %v600_v40  ;;  %v753_v44 = vpop.f32.mrb[15].mxu0 }
 0x468   : > { %605 = vrot.lane.b32.xlu0 %v689_v43, %s821_s28 }
 0x4ca   : > { %v358_v45 = vpop.permute.xlu0 %357 }
 0x4cb   : > { %361 = vst.msk [vmem:[%s931_s25] sm:$0xf] %vm360_vm7, %v358_v45 }
 0x4d2   : > { %v482_v46 = vpop.permute.xlu1 %481 }
 0x4d3   : > { %485 = vst.msk [vmem:[%s931_s25] sm:$0xf] %vm484_vm8, %v482_v46 }
 0x4da   : > { %v606_v47 = vpop.permute.xlu0 %605 }
 0x4db   : > { %609 = vst.msk [vmem:[%s931_s25] sm:$0xf] %vm608_vm9, %v606_v47 }
 0x4dc PF: > { %s11_s6 = sadd.s32 1, %s804_s6  }
 0x4dd   : > { %p8_p4 = scmp.ge.s32.totalorder %s11_s6, 4  }
 0x4df   :  { %10 = sbr.rel (!%p8_p4) target bundleno = 1 (0x1), region = 54 }

</bundles_post_ra>
